<compile_context>
chip_gen: v6e
topology: v6e:2x2x1
jax: 0.10.0
libtpu: 0.0.40
codegen_flags: <defaults>
</compile_context>

<pallas_src>
import functools

import jax
import jax.numpy as jnp
from jax import lax
from jax.experimental import pallas as pl
from jax.experimental.pallas import tpu as pltpu

EPS = 1e-6

# Tile candidates (must divide the dim; otherwise fall back to the full dim,
# which is always a legal block shape).
# TODO(synk): for real-model shapes pad T / odd dims to tile multiples instead
# of relying on the full-dimension fallback.
_MM_M_TILES = (512, 256, 128, 64, 32, 16, 8)
_MM_N_TILES = (1024, 512, 256, 128)
_MM_K_TILES = (2048, 1024, 512, 256, 128)
_SEQ_TILES = (128, 64, 32, 16, 8)          # flash q/kv block (kept small: vregs)


def _pick_tile(dim, candidates):
    for c in candidates:
        if c <= dim and dim % c == 0:
            return c
    return dim


def _norm_row_tile(t, hidden):
    # Keep each (rows, hidden) bf16 block under ~4 MiB so the 5-stream
    # add_rmsnorm stays well inside scoped VMEM even on v7x (64 MiB physical).
    budget = 4 * 1024 * 1024
    cands = tuple(c for c in (1024, 512, 256, 128, 64, 32, 16, 8)
                  if c * hidden * 2 <= budget) or (8,)
    return _pick_tile(t, cands)


def _default_vmem_limit():
    # v5e/v6e: 128 MiB physical -> 96 MiB; v7x: 64 MiB physical -> 48 MiB.
    try:
        cap = int(pltpu.get_tpu_info().vmem_capacity_bytes)
    except Exception:  # noqa: BLE001 - interpret mode / non-TPU fallback
        cap = 128 * 1024 * 1024
    return int(min(96 * 1024 * 1024, cap * 3 // 4))


_VMEM_LIMIT = _default_vmem_limit()


def _mosaic(dimension_semantics):
    return pltpu.CompilerParams(dimension_semantics=dimension_semantics,
                                vmem_limit_bytes=_VMEM_LIMIT)


# ----------------------------- RMSNorm kernels ------------------------------
def _rmsnorm_kernel(x_ref, w_ref, o_ref, *, eps):
    x = x_ref[...].astype(jnp.float32)
    var = jnp.mean(x * x, axis=-1, keepdims=True)
    o_ref[...] = (x * lax.rsqrt(var + eps)
                  * w_ref[...].astype(jnp.float32)).astype(o_ref.dtype)


def rmsnorm(x, w, eps=EPS):
    t, h = x.shape
    tm = _norm_row_tile(t, h)
    spec = pl.BlockSpec((tm, h), lambda i: (i, 0))
    return pl.pallas_call(
        functools.partial(_rmsnorm_kernel, eps=eps),
        out_shape=jax.ShapeDtypeStruct((t, h), x.dtype),
        grid=(t // tm,),
        in_specs=[spec, pl.BlockSpec((1, h), lambda i: (0, 0))],
        out_specs=spec,
        compiler_params=_mosaic(("parallel",)),
    )(x, w.reshape(1, h))


def _add_rmsnorm_kernel(x_ref, r_ref, w_ref, o_ref, nr_ref, *, eps):
    # fused residual-add + RMSNorm (vLLM RMSNorm(x, residual) semantics)
    s = x_ref[...].astype(jnp.float32) + r_ref[...].astype(jnp.float32)
    nr_ref[...] = s.astype(nr_ref.dtype)
    var = jnp.mean(s * s, axis=-1, keepdims=True)
    o_ref[...] = (s * lax.rsqrt(var + eps)
                  * w_ref[...].astype(jnp.float32)).astype(o_ref.dtype)


def add_rmsnorm(x, residual, w, eps=EPS):
    t, h = x.shape
    tm = _norm_row_tile(t, h)
    spec = pl.BlockSpec((tm, h), lambda i: (i, 0))
    wspec = pl.BlockSpec((1, h), lambda i: (0, 0))
    out, new_res = pl.pallas_call(
        functools.partial(_add_rmsnorm_kernel, eps=eps),
        out_shape=(jax.ShapeDtypeStruct((t, h), x.dtype),
                   jax.ShapeDtypeStruct((t, h), x.dtype)),
        grid=(t // tm,),
        in_specs=[spec, spec, wspec],
        out_specs=(spec, spec),
        compiler_params=_mosaic(("parallel",)),
    )(x, residual, w.reshape(1, h))
    return out, new_res


# -------------------------- Tiled linear kernels ----------------------------
def _matmul_kernel(x_ref, w_ref, o_ref, acc_ref):
    @pl.when(pl.program_id(2) == 0)
    def _():
        acc_ref[...] = jnp.zeros_like(acc_ref)

    acc_ref[...] += jnp.dot(x_ref[...], w_ref[...],
                            preferred_element_type=jnp.float32)

    @pl.when(pl.program_id(2) == pl.num_programs(2) - 1)
    def _():
        o_ref[...] = acc_ref[...].astype(o_ref.dtype)


def _matmul_bias_kernel(x_ref, w_ref, b_ref, o_ref, acc_ref):
    @pl.when(pl.program_id(2) == 0)
    def _():
        acc_ref[...] = jnp.zeros_like(acc_ref)

    acc_ref[...] += jnp.dot(x_ref[...], w_ref[...],
                            preferred_element_type=jnp.float32)

    @pl.when(pl.program_id(2) == pl.num_programs(2) - 1)
    def _():
        o_ref[...] = (acc_ref[...]
                      + b_ref[...].astype(jnp.float32)).astype(o_ref.dtype)


def linear(x, w, b=None):
    m, k = x.shape
    _, n = w.shape
    tm = _pick_tile(m, _MM_M_TILES)
    tn = _pick_tile(n, _MM_N_TILES)
    tk = _pick_tile(k, _MM_K_TILES)
    grid = (m // tm, n // tn, k // tk)
    x_spec = pl.BlockSpec((tm, tk), lambda i, j, l: (i, l))
    w_spec = pl.BlockSpec((tk, tn), lambda i, j, l: (l, j))
    o_spec = pl.BlockSpec((tm, tn), lambda i, j, l: (i, j))
    scratch = [pltpu.VMEM((tm, tn), jnp.float32)]
    cp = _mosaic(("parallel", "parallel", "arbitrary"))
    out_shape = jax.ShapeDtypeStruct((m, n), x.dtype)
    if b is None:
        return pl.pallas_call(
            _matmul_kernel, out_shape=out_shape, grid=grid,
            in_specs=[x_spec, w_spec], out_specs=o_spec,
            scratch_shapes=scratch, compiler_params=cp,
        )(x, w)
    b_spec = pl.BlockSpec((1, tn), lambda i, j, l: (0, j))
    return pl.pallas_call(
        _matmul_bias_kernel, out_shape=out_shape, grid=grid,
        in_specs=[x_spec, w_spec, b_spec], out_specs=o_spec,
        scratch_shapes=scratch, compiler_params=cp,
    )(x, w, b.reshape(1, n))


# ---------------- gate/up projection with fused SiluAndMul ------------------
def _gate_up_silu_kernel(x_ref, wg_ref, wu_ref, o_ref, accg_ref, accu_ref):
    @pl.when(pl.program_id(2) == 0)
    def _():
        accg_ref[...] = jnp.zeros_like(accg_ref)
        accu_ref[...] = jnp.zeros_like(accu_ref)

    x = x_ref[...]
    accg_ref[...] += jnp.dot(x, wg_ref[...], preferred_element_type=jnp.float32)
    accu_ref[...] += jnp.dot(x, wu_ref[...], preferred_element_type=jnp.float32)

    @pl.when(pl.program_id(2) == pl.num_programs(2) - 1)
    def _():
        g = accg_ref[...]
        o_ref[...] = (g * jax.nn.sigmoid(g) * accu_ref[...]).astype(o_ref.dtype)


def gate_up_silu(x, w_gate, w_up):
    m, k = x.shape
    _, n = w_gate.shape
    tm = _pick_tile(m, _MM_M_TILES)
    tn = _pick_tile(n, _MM_N_TILES)
    tk = _pick_tile(k, _MM_K_TILES)
    grid = (m // tm, n // tn, k // tk)
    x_spec = pl.BlockSpec((tm, tk), lambda i, j, l: (i, l))
    wg_spec = pl.BlockSpec((tk, tn), lambda i, j, l: (l, j))
    wu_spec = pl.BlockSpec((tk, tn), lambda i, j, l: (l, j))
    o_spec = pl.BlockSpec((tm, tn), lambda i, j, l: (i, j))
    return pl.pallas_call(
        _gate_up_silu_kernel,
        out_shape=jax.ShapeDtypeStruct((m, n), x.dtype),
        grid=grid,
        in_specs=[x_spec, wg_spec, wu_spec],
        out_specs=o_spec,
        scratch_shapes=[pltpu.VMEM((tm, tn), jnp.float32),
                        pltpu.VMEM((tm, tn), jnp.float32)],
        compiler_params=_mosaic(("parallel", "parallel", "arbitrary")),
    )(x, w_gate, w_up)


# -------------------- RoPE applied once to Q/K columns ----------------------
def _rope_kernel(x_ref, cos_ref, sin_ref, o_ref, *, num_q_heads, scale, half):
    h = pl.program_id(0)
    x = x_ref[...].astype(jnp.float32)
    rot = jnp.concatenate([x[:, half:], x[:, :half]], axis=1)
    y = x * cos_ref[...] + rot * sin_ref[...]          # sin is sign-folded
    y = y * jnp.where(h < num_q_heads, scale, 1.0)     # fold softmax scale in Q
    o_ref[...] = y.astype(o_ref.dtype)


def rope_qk(qkv, cos, sin_signed, num_heads, head_dim, scale):
    # qkv: (T, 3*H). Applies RoPE (and the softmax scale for Q) to the first
    # 2*H columns, producing qk_rot: (T, 2*H). Per-head column BlockSpecs.
    t = qkv.shape[0]
    tr = _norm_row_tile(t, head_dim)
    grid = (2 * num_heads, t // tr)
    x_spec = pl.BlockSpec((tr, head_dim), lambda h, i: (i, h))
    tab_spec = pl.BlockSpec((tr, head_dim), lambda h, i: (i, 0))
    o_spec = pl.BlockSpec((tr, head_dim), lambda h, i: (i, h))
    return pl.pallas_call(
        functools.partial(_rope_kernel, num_q_heads=num_heads, scale=scale,
                          half=head_dim // 2),
        out_shape=jax.ShapeDtypeStruct((t, 2 * num_heads * head_dim), qkv.dtype),
        grid=grid,
        in_specs=[x_spec, tab_spec, tab_spec],
        out_specs=o_spec,
        compiler_params=_mosaic(("parallel", "parallel")),
    )(qkv, cos, sin_signed)


# ----------------- Causal flash attention (online softmax) ------------------
def _flash_kernel(qi_map, ki_map, q_ref, k_ref, v_ref, o_ref,
                  m_sc, l_sc, acc_sc, *, block):
    p = pl.program_id(1)
    qi = qi_map[p]
    ki = ki_map[p]

    @pl.when(ki == 0)
    def _():
        m_sc[...] = jnp.full_like(m_sc, -jnp.inf)
        l_sc[...] = jnp.zeros_like(l_sc)
        acc_sc[...] = jnp.zeros_like(acc_sc)

    s = lax.dot_general(q_ref[...], k_ref[...], (((1,), (1,)), ((), ())),
                        preferred_element_type=jnp.float32)     # (block, block)

    # The schedule only visits ki <= qi; only the diagonal block is actually
    # partially masked (interior blocks: the where is an identity).
    row = qi * block + lax.broadcasted_iota(jnp.int32, (block, block), 0)
    col = ki * block + lax.broadcasted_iota(jnp.int32, (block, block), 1)
    s = jnp.where(col <= row, s, -1e30)

    m_prev = m_sc[...]
    m_new = jnp.maximum(m_prev, jnp.max(s, axis=-1, keepdims=True))
    alpha = jnp.exp(m_prev - m_new)
    prob = jnp.exp(s - m_new)
    l_sc[...] = alpha * l_sc[...] + jnp.sum(prob, axis=-1, keepdims=True)
    acc_sc[...] = alpha * acc_sc[...] + jnp.dot(
        prob.astype(v_ref.dtype), v_ref[...], preferred_element_type=jnp.float32)
    m_sc[...] = m_new

    @pl.when(ki == qi)   # last kv block for this q block (causal, tq == tkv)
    def _():
        o_ref[...] = (acc_sc[...]
                      * pl.reciprocal(l_sc[...], approx=True)).astype(o_ref.dtype)


def _causal_schedule(num_blocks):
    qs, ks = [], []
    for qi in range(num_blocks):
        for ki in range(qi + 1):
            qs.append(qi)
            ks.append(ki)
    return (jnp.asarray(qs, dtype=jnp.int32), jnp.asarray(ks, dtype=jnp.int32))


def _flash_scratch(blk, hd):
    return [pltpu.VMEM((blk, 1), jnp.float32),    # running max
            pltpu.VMEM((blk, 1), jnp.float32),    # running sum
            pltpu.VMEM((blk, hd), jnp.float32)]   # output accumulator


def flash_attention_lane_aligned(qk_rot, qkv, num_heads, head_dim):
    # q/k read from qk_rot (T, 2H), v read from qkv (T, 3H), output written
    # directly in (T, hidden) layout -- no wrapper transposes.
    t = qkv.shape[0]
    nh = num_heads
    blk = _pick_tile(t, _SEQ_TILES)
    qi_arr, ki_arr = _causal_schedule(t // blk)
    grid = (nh, int(qi_arr.shape[0]))
    q_spec = pl.BlockSpec((blk, head_dim), lambda h, p, qi, ki: (qi[p], h))
    k_spec = pl.BlockSpec((blk, head_dim), lambda h, p, qi, ki: (ki[p], nh + h))
    v_spec = pl.BlockSpec((blk, head_dim),
                          lambda h, p, qi, ki: (ki[p], 2 * nh + h))
    o_spec = pl.BlockSpec((blk, head_dim), lambda h, p, qi, ki: (qi[p], h))
    return pl.pallas_call(
        functools.partial(_flash_kernel, block=blk),
        out_shape=jax.ShapeDtypeStruct((t, nh * head_dim), qkv.dtype),
        grid_spec=pltpu.PrefetchScalarGridSpec(
            num_scalar_prefetch=2, grid=grid,
            in_specs=[q_spec, k_spec, v_spec],
            out_specs=o_spec,
            scratch_shapes=_flash_scratch(blk, head_dim)),
        compiler_params=_mosaic(("parallel", "arbitrary")),
    )(qi_arr, ki_arr, qk_rot, qk_rot, qkv)


def flash_attention_heads_major(q, k, v):
    # Fallback layout for head dims that are not lane-aligned: (nh, T, hd).
    nh, t, hd = q.shape
    blk = _pick_tile(t, _SEQ_TILES)
    qi_arr, ki_arr = _causal_schedule(t // blk)
    grid = (nh, int(qi_arr.shape[0]))
    q_spec = pl.BlockSpec((None, blk, hd), lambda h, p, qi, ki: (h, qi[p], 0))
    k_spec = pl.BlockSpec((None, blk, hd), lambda h, p, qi, ki: (h, ki[p], 0))
    v_spec = pl.BlockSpec((None, blk, hd), lambda h, p, qi, ki: (h, ki[p], 0))
    o_spec = pl.BlockSpec((None, blk, hd), lambda h, p, qi, ki: (h, qi[p], 0))
    return pl.pallas_call(
        functools.partial(_flash_kernel, block=blk),
        out_shape=jax.ShapeDtypeStruct((nh, t, hd), q.dtype),
        grid_spec=pltpu.PrefetchScalarGridSpec(
            num_scalar_prefetch=2, grid=grid,
            in_specs=[q_spec, k_spec, v_spec],
            out_specs=o_spec,
            scratch_shapes=_flash_scratch(blk, hd)),
        compiler_params=_mosaic(("parallel", "arbitrary")),
    )(qi_arr, ki_arr, q, k, v)


# ------------------------------- QWenBlock ----------------------------------
def _rope_tables(positions, head_dim, rope_theta):
    inv_freq = 1.0 / (rope_theta ** (jnp.arange(0, head_dim, 2,
                                                dtype=jnp.float32) / head_dim))
    freqs = positions.astype(jnp.float32)[:, None] * inv_freq[None, :]
    cos = jnp.concatenate([jnp.cos(freqs), jnp.cos(freqs)], axis=-1)
    # sign-folded so rotate_half(x)*sin == roll_half(x)*sin_signed
    sin_signed = jnp.concatenate([-jnp.sin(freqs), jnp.sin(freqs)], axis=-1)
    return cos, sin_signed


def qwen_block(positions, hidden_states, params, residual=None, *,
               num_heads, rope_theta=10000.0, eps=EPS):
    t, hidden = hidden_states.shape
    head_dim = hidden // num_heads
    scale = head_dim ** -0.5

    # ln_1 (optionally fused with incoming residual)
    if residual is None:
        residual = hidden_states
        h = rmsnorm(hidden_states, params["ln1_w"], eps)
    else:
        h, residual = add_rmsnorm(hidden_states, residual, params["ln1_w"], eps)

    # ---- attention ----
    qkv = linear(h, params["c_attn_w"], params["c_attn_b"])           # (T, 3H)
    cos, sin_signed = _rope_tables(positions, head_dim, rope_theta)   # (T, hd)

    if head_dim % 128 == 0:
        # Lane-aligned heads: RoPE applied once in a Pallas kernel, then the
        # flash kernel slices q/k/v and writes (T, hidden) directly.
        qk_rot = rope_qk(qkv, cos, sin_signed, num_heads, head_dim, scale)
        attn = flash_attention_lane_aligned(qk_rot, qkv, num_heads, head_dim)
    else:
        # Fallback (toy / non-lane-aligned head dims): RoPE in plain JAX and a
        # heads-major flash kernel.
        q, k, v = jnp.split(qkv, 3, axis=-1)

        def rope_jnp(x, s):
            xh = x.reshape(t, num_heads, head_dim).astype(jnp.float32)
            rot = jnp.concatenate([xh[..., head_dim // 2:],
                                   xh[..., :head_dim // 2]], axis=-1)
            return (xh * cos[:, None, :] + rot * sin_signed[:, None, :]) * s

        q_r = rope_jnp(q, scale).astype(qkv.dtype).transpose(1, 0, 2)
        k_r = rope_jnp(k, 1.0).astype(qkv.dtype).transpose(1, 0, 2)
        v_h = v.reshape(t, num_heads, head_dim).transpose(1, 0, 2)
        attn_h = flash_attention_heads_major(q_r, k_r, v_h)
        attn = attn_h.transpose(1, 0, 2).reshape(t, hidden)

    attn_out = linear(attn, params["c_proj_w"])                        # no bias

    # ln_2 (fused residual add)
    h, residual = add_rmsnorm(attn_out, residual, params["ln2_w"], eps)

    # ---- MLP: gate/up matmul with fused SiluAndMul, then down proj ----
    act = gate_up_silu(h, params["gate_w"], params["up_w"])
    out = linear(act, params["mlp_c_proj_w"])
    return out, residual


# ------------------------ pure-JAX reference (checks) -----------------------
def qwen_block_reference(positions, hidden_states, params, residual=None, *,
                         num_heads, rope_theta=10000.0, eps=EPS):
    dt = hidden_states.dtype
    t, hidden = hidden_states.shape
    hd = hidden // num_heads
    scale = hd ** -0.5

    def rms(xf, w):
        var = jnp.mean(xf * xf, axis=-1, keepdims=True)
        return (xf * lax.rsqrt(var + eps) * w.astype(jnp.float32)).astype(dt)

    def lin(x, w, b=None):
        y = jnp.dot(x, w, preferred_element_type=jnp.float32)
        if b is not None:
            y = y + b.astype(jnp.float32)
        return y.astype(dt)

    if residual is None:
        residual = hidden_states
        h = rms(hidden_states.astype(jnp.float32), params["ln1_w"])
    else:
        s0 = hidden_states.astype(jnp.float32) + residual.astype(jnp.float32)
        residual = s0.astype(dt)
        h = rms(s0, params["ln1_w"])

    qkv = lin(h, params["c_attn_w"], params["c_attn_b"])
    q, k, v = jnp.split(qkv, 3, axis=-1)
    q = q.reshape(t, num_heads, hd).astype(jnp.float32)
    k = k.reshape(t, num_heads, hd).astype(jnp.float32)
    v = v.reshape(t, num_heads, hd).astype(jnp.float32)

    inv_freq = 1.0 / (rope_theta ** (jnp.arange(0, hd, 2,
                                                dtype=jnp.float32) / hd))
    freqs = positions.astype(jnp.float32)[:, None] * inv_freq[None, :]
    cos = jnp.concatenate([jnp.cos(freqs)] * 2, axis=-1)[:, None, :]
    sin = jnp.concatenate([jnp.sin(freqs)] * 2, axis=-1)[:, None, :]

    def rope(x):
        x1, x2 = x[..., :hd // 2], x[..., hd // 2:]
        return x * cos + jnp.concatenate([-x2, x1], axis=-1) * sin

    qr = (rope(q) * scale).astype(dt).astype(jnp.float32)
    kr = rope(k).astype(dt).astype(jnp.float32)

    s = jnp.einsum("tnd,snd->nts", qr, kr)
    causal = positions[:, None] >= positions[None, :]
    s = jnp.where(causal[None, :, :], s, -1e30)
    p = jax.nn.softmax(s, axis=-1)
    attn = jnp.einsum("nts,snd->tnd", p.astype(dt).astype(jnp.float32), v)
    attn = attn.reshape(t, hidden).astype(dt)

    attn_out = lin(attn, params["c_proj_w"])

    s2 = attn_out.astype(jnp.float32) + residual.astype(jnp.float32)
    residual = s2.astype(dt)
    h2 = rms(s2, params["ln2_w"])

    g = jnp.dot(h2, params["gate_w"], preferred_element_type=jnp.float32)
    u = jnp.dot(h2, params["up_w"], preferred_element_type=jnp.float32)
    act = (g * jax.nn.sigmoid(g) * u).astype(dt)
    out = lin(act, params["mlp_c_proj_w"])
    return out, residual


# --------------------------------- params -----------------------------------
def init_params(key, hidden, num_heads, mlp_intermediate, dtype=jnp.bfloat16):
    ks = jax.random.split(key, 8)
    s = 0.05

    def rnd(k, shape):
        return (s * jax.random.normal(k, shape, jnp.float32)).astype(dtype)

    return {
        "ln1_w": (1.0 + s * jax.random.normal(ks[0], (hidden,),
                                              jnp.float32)).astype(dtype),
        "ln2_w": (1.0 + s * jax.random.normal(ks[1], (hidden,),
                                              jnp.float32)).astype(dtype),
        "c_attn_w": rnd(ks[2], (hidden, 3 * hidden)),
        "c_attn_b": rnd(ks[3], (3 * hidden,)),
        "c_proj_w": rnd(ks[4], (hidden, hidden)),
        # MergedColumnParallelLinear stored as its two logical halves.
        "gate_w": rnd(ks[5], (hidden, mlp_intermediate)),
        "up_w": rnd(ks[6], (hidden, mlp_intermediate)),
        "mlp_c_proj_w": rnd(ks[7], (mlp_intermediate, hidden)),
    }


if __name__ == "__main__":
    key = jax.random.PRNGKey(0)

    def run_case(name, t, hidden, num_heads, mlp_intermediate, sub):
        k_in, k_par = jax.random.split(jax.random.fold_in(key, sub))
        hidden_states = jax.random.normal(k_in, (t, hidden),
                                          jnp.float32).astype(jnp.bfloat16)
        positions = jnp.arange(t, dtype=jnp.int32)
        params = init_params(k_par, hidden, num_heads, mlp_intermediate)

        block = jax.jit(functools.partial(qwen_block, num_heads=num_heads))
        out, res = block(positions, hidden_states, params, None)
        jax.block_until_ready((out, res))

        out_r, res_r = qwen_block_reference(positions, hidden_states, params,
                                            None, num_heads=num_heads)
        o, orf = out.astype(jnp.float32), out_r.astype(jnp.float32)
        r, rrf = res.astype(jnp.float32), res_r.astype(jnp.float32)
        assert out.shape == (t, hidden) and res.shape == (t, hidden)
        assert bool(jnp.all(jnp.isfinite(o))) and bool(jnp.all(jnp.isfinite(r)))
        assert bool(jnp.allclose(o, orf, atol=5e-2, rtol=5e-2)), (
            f"{name}: out mismatch, max err {float(jnp.max(jnp.abs(o - orf)))}")
        assert bool(jnp.allclose(r, rrf, atol=5e-2, rtol=5e-2)), (
            f"{name}: residual mismatch, max err "
            f"{float(jnp.max(jnp.abs(r - rrf)))}")

    # Tiny config (head_dim=8): exercises the fallback heads-major path.
    # hidden_size=32, num_heads=4, config.intermediate_size=128 -> mlp inter 64
    run_case("tiny", t=8, hidden=32, num_heads=4, mlp_intermediate=64, sub=0)

    # Lane-aligned config (head_dim=128): exercises the optimized direct-slice
    # path (Pallas RoPE + causal-scheduled flash attention, no transposes).
    run_case("lane", t=256, hidden=256, num_heads=2, mlp_intermediate=512,
             sub=1)

    print("KERNEL_OK")
</pallas_src>

<mosaic_0001>
module attributes {stable_mosaic.version = 11 : i64} {
  func.func @_matmul_bias_kernel(%arg0: i32, %arg1: i32, %arg2: i32, %arg3: memref<8x32xbf16, #tpu.memory_space<vmem>>, %arg4: memref<32x96xbf16, #tpu.memory_space<vmem>>, %arg5: memref<1x96xbf16, #tpu.memory_space<vmem>>, %arg6: memref<8x96xbf16, #tpu.memory_space<vmem>>, %arg7: memref<8x96xf32, #tpu.memory_space<vmem>>) attributes {dimension_semantics = [#tpu.dimension_semantics<parallel>, #tpu.dimension_semantics<parallel>, #tpu.dimension_semantics<arbitrary>], iteration_bounds = array<i64: 1, 1, 1>, scalar_prefetch = 0 : i64, scratch_operands = 1 : i64, tpu.core_type = #tpu.core_type<tc>, window_params = [{transform_indices = @transform_0, window_bounds = array<i64: 8, 32>}, {transform_indices = @transform_1, window_bounds = array<i64: 32, 96>}, {transform_indices = @transform_2, window_bounds = array<i64: 1, 96>}, {transform_indices = @transform_3, window_bounds = array<i64: 8, 96>}]} {
    %c0_i32 = arith.constant 0 : i32
    %0 = arith.cmpi eq, %arg2, %c0_i32 : i32
    %1 = arith.extui %0 : i1 to i32
    %c0_i32_0 = arith.constant 0 : i32
    %2 = arith.cmpi ne, %1, %c0_i32_0 : i32
    scf.if %2 {
      %cst_10 = arith.constant 0.000000e+00 : f32
      %12 = vector.broadcast %cst_10 : f32 to vector<8x96xf32>
      %c0_11 = arith.constant 0 : index
      %c0_12 = arith.constant 0 : index
      %13 = vector.load %arg7[%c0_11, %c0_12] : memref<8x96xf32, #tpu.memory_space<vmem>>, vector<8x96xf32>
      tpu.vector_store %arg7[%c0_11, %c0_12], %12 {strides = array<i32>} : memref<8x96xf32, #tpu.memory_space<vmem>>, vector<8x96xf32>,
    } else {
    }
    %c0 = arith.constant 0 : index
    %c0_1 = arith.constant 0 : index
    %3 = vector.load %arg7[%c0, %c0_1] : memref<8x96xf32, #tpu.memory_space<vmem>>, vector<8x96xf32>
    %c0_2 = arith.constant 0 : index
    %c0_3 = arith.constant 0 : index
    %4 = vector.load %arg3[%c0_2, %c0_3] : memref<8x32xbf16, #tpu.memory_space<vmem>>, vector<8x32xbf16>
    %c0_4 = arith.constant 0 : index
    %c0_5 = arith.constant 0 : index
    %5 = vector.load %arg4[%c0_4, %c0_5] : memref<32x96xbf16, #tpu.memory_space<vmem>>, vector<32x96xbf16>
    %cst = arith.constant dense<0.000000e+00> : vector<8x96xf32>
    %6 = tpu.matmul %4, %5, %cst {dimension_numbers = #tpu.dot_dimension_numbers<[1], [0], [0], [1], [0, 0, 1, 1], [], []>} : vector<8x32xbf16>, vector<32x96xbf16>, vector<8x96xf32> -> vector<8x96xf32>
    %7 = arith.addf %3, %6 : vector<8x96xf32>
    %c0_6 = arith.constant 0 : index
    %c0_7 = arith.constant 0 : index
    %8 = vector.load %arg7[%c0_6, %c0_7] : memref<8x96xf32, #tpu.memory_space<vmem>>, vector<8x96xf32>
    tpu.vector_store %arg7[%c0_6, %c0_7], %7 {strides = array<i32>} : memref<8x96xf32, #tpu.memory_space<vmem>>, vector<8x96xf32>,
    %c0_i32_8 = arith.constant 0 : i32
    %9 = arith.cmpi eq, %arg2, %c0_i32_8 : i32
    %10 = arith.extui %9 : i1 to i32
    %c0_i32_9 = arith.constant 0 : i32
    %11 = arith.cmpi ne, %10, %c0_i32_9 : i32
    scf.if %11 {
      %c0_10 = arith.constant 0 : index
      %c0_11 = arith.constant 0 : index
      %12 = vector.load %arg7[%c0_10, %c0_11] : memref<8x96xf32, #tpu.memory_space<vmem>>, vector<8x96xf32>
      %c0_12 = arith.constant 0 : index
      %c0_13 = arith.constant 0 : index
      %13 = vector.load %arg5[%c0_12, %c0_13] : memref<1x96xbf16, #tpu.memory_space<vmem>>, vector<1x96xbf16>
      %14 = arith.extf %13 : vector<1x96xbf16> to vector<1x96xf32>
      %15 = vector.broadcast %14 : vector<1x96xf32> to vector<8x96xf32>
      %16 = arith.addf %12, %15 : vector<8x96xf32>
      %17 = arith.truncf %16 : vector<8x96xf32> to vector<8x96xbf16>
      %c0_14 = arith.constant 0 : index
      %c0_15 = arith.constant 0 : index
      %18 = vector.load %arg6[%c0_14, %c0_15] : memref<8x96xbf16, #tpu.memory_space<vmem>>, vector<8x96xbf16>
      tpu.vector_store %arg6[%c0_14, %c0_15], %17 {strides = array<i32>} : memref<8x96xbf16, #tpu.memory_space<vmem>>, vector<8x96xbf16>,
    } else {
    }
    return
  }
  func.func @transform_0(%arg0: i32, %arg1: i32, %arg2: i32) -> (i32, i32) {
    %c0_i32 = arith.constant 0 : i32
    return %arg0, %arg2 : i32, i32
  }
  func.func @transform_1(%arg0: i32, %arg1: i32, %arg2: i32) -> (i32, i32) {
    %c0_i32 = arith.constant 0 : i32
    return %arg2, %arg1 : i32, i32
  }
  func.func @transform_2(%arg0: i32, %arg1: i32, %arg2: i32) -> (i32, i32) {
    %c0_i32 = arith.constant 0 : i32
    %c0_i32_0 = arith.constant 0 : i32
    return %c0_i32, %arg1 : i32, i32
  }
  func.func @transform_3(%arg0: i32, %arg1: i32, %arg2: i32) -> (i32, i32) {
    %c0_i32 = arith.constant 0 : i32
    return %arg0, %arg1 : i32, i32
  }
}

module attributes {stable_mosaic.version = 11 : i64} {
  func.func @_rmsnorm_kernel(%arg0: i32, %arg1: memref<8x32xbf16, #tpu.memory_space<vmem>>, %arg2: memref<1x32xbf16, #tpu.memory_space<vmem>>, %arg3: memref<8x32xbf16, #tpu.memory_space<vmem>>) attributes {dimension_semantics = [#tpu.dimension_semantics<parallel>], iteration_bounds = array<i64: 1>, scalar_prefetch = 0 : i64, scratch_operands = 0 : i64, tpu.core_type = #tpu.core_type<tc>, window_params = [{transform_indices = @transform_0, window_bounds = array<i64: 8, 32>}, {pipeline_mode = #tpu.pipeline_mode<synchronous>, transform_indices = @transform_1, window_bounds = array<i64: 1, 32>}, {transform_indices = @transform_2, window_bounds = array<i64: 8, 32>}]} {
    %c0 = arith.constant 0 : index
    %c0_0 = arith.constant 0 : index
    %0 = vector.load %arg1[%c0, %c0_0] : memref<8x32xbf16, #tpu.memory_space<vmem>>, vector<8x32xbf16>
    %1 = arith.extf %0 : vector<8x32xbf16> to vector<8x32xf32>
    %2 = arith.mulf %1, %1 : vector<8x32xf32>
    %cst = arith.constant dense<0.000000e+00> : vector<8xf32>
    %3 = vector.multi_reduction <add>, %2, %cst [1] : vector<8x32xf32> to vector<8xf32>
    %4 = vector.shape_cast %3 : vector<8xf32> to vector<8x1xf32>
    %cst_1 = arith.constant 3.200000e+01 : f32
    %5 = vector.broadcast %cst_1 : f32 to vector<8x1xf32>
    %6 = arith.divf %4, %5 : vector<8x1xf32>
    %cst_2 = arith.constant 9.99999997E-7 : f32
    %7 = vector.broadcast %cst_2 : f32 to vector<8x1xf32>
    %8 = arith.addf %6, %7 : vector<8x1xf32>
    %9 = math.rsqrt %8 : vector<8x1xf32>
    %10 = vector.broadcast %9 : vector<8x1xf32> to vector<8x32xf32>
    %11 = arith.mulf %1, %10 : vector<8x32xf32>
    %c0_3 = arith.constant 0 : index
    %c0_4 = arith.constant 0 : index
    %12 = vector.load %arg2[%c0_3, %c0_4] : memref<1x32xbf16, #tpu.memory_space<vmem>>, vector<1x32xbf16>
    %13 = arith.extf %12 : vector<1x32xbf16> to vector<1x32xf32>
    %14 = vector.broadcast %13 : vector<1x32xf32> to vector<8x32xf32>
    %15 = arith.mulf %11, %14 : vector<8x32xf32>
    %16 = arith.truncf %15 : vector<8x32xf32> to vector<8x32xbf16>
    %c0_5 = arith.constant 0 : index
    %c0_6 = arith.constant 0 : index
    %17 = vector.load %arg3[%c0_5, %c0_6] : memref<8x32xbf16, #tpu.memory_space<vmem>>, vector<8x32xbf16>
    tpu.vector_store %arg3[%c0_5, %c0_6], %16 {strides = array<i32>} : memref<8x32xbf16, #tpu.memory_space<vmem>>, vector<8x32xbf16>,
    return
  }
  func.func @transform_0(%arg0: i32) -> (i32, i32) {
    %c0_i32 = arith.constant 0 : i32
    %c0_i32_0 = arith.constant 0 : i32
    return %arg0, %c0_i32 : i32, i32
  }
  func.func @transform_1(%arg0: i32) -> (i32, i32) {
    %c0_i32 = arith.constant 0 : i32
    %c0_i32_0 = arith.constant 0 : i32
    %c0_i32_1 = arith.constant 0 : i32
    return %c0_i32, %c0_i32_0 : i32, i32
  }
  func.func @transform_2(%arg0: i32) -> (i32, i32) {
    %c0_i32 = arith.constant 0 : i32
    %c0_i32_0 = arith.constant 0 : i32
    return %arg0, %c0_i32 : i32, i32
  }
}

module attributes {stable_mosaic.version = 11 : i64} {
  func.func @_flash_kernel(%arg0: i32, %arg1: i32, %arg2: memref<1xi32, #tpu.memory_space<smem>>, %arg3: memref<1xi32, #tpu.memory_space<smem>>, %arg4: memref<1x8x8xbf16, #tpu.memory_space<vmem>>, %arg5: memref<1x8x8xbf16, #tpu.memory_space<vmem>>, %arg6: memref<1x8x8xbf16, #tpu.memory_space<vmem>>, %arg7: memref<1x8x8xbf16, #tpu.memory_space<vmem>>, %arg8: memref<8x1xf32, #tpu.memory_space<vmem>>, %arg9: memref<8x1xf32, #tpu.memory_space<vmem>>, %arg10: memref<8x8xf32, #tpu.memory_space<vmem>>) attributes {dimension_semantics = [#tpu.dimension_semantics<parallel>, #tpu.dimension_semantics<arbitrary>], iteration_bounds = array<i64: 4, 1>, scalar_prefetch = 2 : i64, scratch_operands = 3 : i64, tpu.core_type = #tpu.core_type<tc>, window_params = [{transform_indices = @transform_0, window_bounds = array<i64: 1, 8, 8>}, {transform_indices = @transform_1, window_bounds = array<i64: 1, 8, 8>}, {transform_indices = @transform_2, window_bounds = array<i64: 1, 8, 8>}, {transform_indices = @transform_3, window_bounds = array<i64: 1, 8, 8>}]} {
    %0 = arith.index_cast %arg1 : i32 to index
    %1 = memref.load %arg2[%0] : memref<1xi32, #tpu.memory_space<smem>>
    %2 = arith.index_cast %arg1 : i32 to index
    %3 = memref.load %arg3[%2] : memref<1xi32, #tpu.memory_space<smem>>
    %c0_i32 = arith.constant 0 : i32
    %4 = arith.cmpi eq, %3, %c0_i32 : i32
    %5 = arith.extui %4 : i1 to i32
    %c0_i32_0 = arith.constant 0 : i32
    %6 = arith.cmpi ne, %5, %c0_i32_0 : i32
    scf.if %6 {
      %cst_27 = arith.constant 0xFF800000 : f32
      %51 = vector.broadcast %cst_27 : f32 to vector<8x1xf32>
      %c0_28 = arith.constant 0 : index
      %c0_29 = arith.constant 0 : index
      %52 = vector.load %arg8[%c0_28, %c0_29] : memref<8x1xf32, #tpu.memory_space<vmem>>, vector<8x1xf32>
      tpu.vector_store %arg8[%c0_28, %c0_29], %51 {strides = array<i32>} : memref<8x1xf32, #tpu.memory_space<vmem>>, vector<8x1xf32>,
      %cst_30 = arith.constant 0.000000e+00 : f32
      %53 = vector.broadcast %cst_30 : f32 to vector<8x1xf32>
      %c0_31 = arith.constant 0 : index
      %c0_32 = arith.constant 0 : index
      %54 = vector.load %arg9[%c0_31, %c0_32] : memref<8x1xf32, #tpu.memory_space<vmem>>, vector<8x1xf32>
      tpu.vector_store %arg9[%c0_31, %c0_32], %53 {strides = array<i32>} : memref<8x1xf32, #tpu.memory_space<vmem>>, vector<8x1xf32>,
      %cst_33 = arith.constant 0.000000e+00 : f32
      %55 = vector.broadcast %cst_33 : f32 to vector<8x8xf32>
      %c0_34 = arith.constant 0 : index
      %c0_35 = arith.constant 0 : index
      %56 = vector.load %arg10[%c0_34, %c0_35] : memref<8x8xf32, #tpu.memory_space<vmem>>, vector<8x8xf32>
      tpu.vector_store %arg10[%c0_34, %c0_35], %55 {strides = array<i32>} : memref<8x8xf32, #tpu.memory_space<vmem>>, vector<8x8xf32>,
    } else {
    }
    %c0 = arith.constant 0 : index
    %c0_1 = arith.constant 0 : index
    %c0_2 = arith.constant 0 : index
    %7 = vector.load %arg4[%c0, %c0_1, %c0_2] : memref<1x8x8xbf16, #tpu.memory_space<vmem>>, vector<1x8x8xbf16>
    %8 = vector.shape_cast %7 : vector<1x8x8xbf16> to vector<8x8xbf16>
    %c0_3 = arith.constant 0 : index
    %c0_4 = arith.constant 0 : index
    %c0_5 = arith.constant 0 : index
    %9 = vector.load %arg5[%c0_3, %c0_4, %c0_5] : memref<1x8x8xbf16, #tpu.memory_space<vmem>>, vector<1x8x8xbf16>
    %10 = vector.shape_cast %9 : vector<1x8x8xbf16> to vector<8x8xbf16>
    %cst = arith.constant dense<0.000000e+00> : vector<8x8xf32>
    %11 = tpu.matmul %8, %10, %cst {dimension_numbers = #tpu.dot_dimension_numbers<[1], [1], [0], [0], [0, 0, 1, 0], [], []>} : vector<8x8xbf16>, vector<8x8xbf16>, vector<8x8xf32> -> vector<8x8xf32>
    %c8_i32 = arith.constant 8 : i32
    %12 = arith.muli %1, %c8_i32 : i32
    %13 = tpu.iota {dimensions = array<i32: 0>} : vector<8x8xi32>
    %14 = vector.broadcast %12 : i32 to vector<8x8xi32>
    %15 = arith.addi %14, %13 : vector<8x8xi32>
    %c8_i32_6 = arith.constant 8 : i32
    %16 = arith.muli %3, %c8_i32_6 : i32
    %17 = tpu.iota {dimensions = array<i32: 1>} : vector<8x8xi32>
    %18 = vector.broadcast %16 : i32 to vector<8x8xi32>
    %19 = arith.addi %18, %17 : vector<8x8xi32>
    %20 = arith.cmpi sle, %19, %15 : vector<8x8xi32>
    %cst_7 = arith.constant -1.000000e+30 : f32
    %21 = vector.broadcast %cst_7 : f32 to vector<8x8xf32>
    %22 = arith.select %20, %11, %21 : vector<8x8xi1>, vector<8x8xf32>
    %c0_8 = arith.constant 0 : index
    %c0_9 = arith.constant 0 : index
    %23 = vector.load %arg8[%c0_8, %c0_9] : memref<8x1xf32, #tpu.memory_space<vmem>>, vector<8x1xf32>
    %cst_10 = arith.constant dense<0xFF800000> : vector<8xf32>
    %24 = vector.multi_reduction <maximumf>, %22, %cst_10 [1] : vector<8x8xf32> to vector<8xf32>
    %25 = vector.shape_cast %24 : vector<8xf32> to vector<8x1xf32>
    %26 = arith.maximumf %23, %25 : vector<8x1xf32>
    %27 = arith.subf %23, %26 : vector<8x1xf32>
    %28 = math.exp %27 : vector<8x1xf32>
    %29 = vector.broadcast %26 : vector<8x1xf32> to vector<8x8xf32>
    %30 = arith.subf %22, %29 : vector<8x8xf32>
    %31 = math.exp %30 : vector<8x8xf32>
    %c0_11 = arith.constant 0 : index
    %c0_12 = arith.constant 0 : index
    %32 = vector.load %arg9[%c0_11, %c0_12] : memref<8x1xf32, #tpu.memory_space<vmem>>, vector<8x1xf32>
    %33 = arith.mulf %28, %32 : vector<8x1xf32>
    %cst_13 = arith.constant dense<0.000000e+00> : vector<8xf32>
    %34 = vector.multi_reduction <add>, %31, %cst_13 [1] : vector<8x8xf32> to vector<8xf32>
    %35 = vector.shape_cast %34 : vector<8xf32> to vector<8x1xf32>
    %36 = arith.addf %33, %35 : vector<8x1xf32>
    %c0_14 = arith.constant 0 : index
    %c0_15 = arith.constant 0 : index
    %37 = vector.load %arg9[%c0_14, %c0_15] : memref<8x1xf32, #tpu.memory_space<vmem>>, vector<8x1xf32>
    tpu.vector_store %arg9[%c0_14, %c0_15], %36 {strides = array<i32>} : memref<8x1xf32, #tpu.memory_space<vmem>>, vector<8x1xf32>,
    %c0_16 = arith.constant 0 : index
    %c0_17 = arith.constant 0 : index
    %38 = vector.load %arg10[%c0_16, %c0_17] : memref<8x8xf32, #tpu.memory_space<vmem>>, vector<8x8xf32>
    %39 = vector.broadcast %28 : vector<8x1xf32> to vector<8x8xf32>
    %40 = arith.mulf %39, %38 : vector<8x8xf32>
    %41 = arith.truncf %31 : vector<8x8xf32> to vector<8x8xbf16>
    %c0_18 = arith.constant 0 : index
    %c0_19 = arith.constant 0 : index
    %c0_20 = arith.constant 0 : index
    %42 = vector.load %arg6[%c0_18, %c0_19, %c0_20] : memref<1x8x8xbf16, #tpu.memory_space<vmem>>, vector<1x8x8xbf16>
    %43 = vector.shape_cast %42 : vector<1x8x8xbf16> to vector<8x8xbf16>
    %cst_21 = arith.constant dense<0.000000e+00> : vector<8x8xf32>
    %44 = tpu.matmul %41, %43, %cst_21 {dimension_numbers = #tpu.dot_dimension_numbers<[1], [0], [0], [1], [0, 0, 1, 1], [], []>} : vector<8x8xbf16>, vector<8x8xbf16>, vector<8x8xf32> -> vector<8x8xf32>
    %45 = arith.addf %40, %44 : vector<8x8xf32>
    %c0_22 = arith.constant 0 : index
    %c0_23 = arith.constant 0 : index
    %46 = vector.load %arg10[%c0_22, %c0_23] : memref<8x8xf32, #tpu.memory_space<vmem>>, vector<8x8xf32>
    tpu.vector_store %arg10[%c0_22, %c0_23], %45 {strides = array<i32>} : memref<8x8xf32, #tpu.memory_space<vmem>>, vector<8x8xf32>,
    %c0_24 = arith.constant 0 : index
    %c0_25 = arith.constant 0 : index
    %47 = vector.load %arg8[%c0_24, %c0_25] : memref<8x1xf32, #tpu.memory_space<vmem>>, vector<8x1xf32>
    tpu.vector_store %arg8[%c0_24, %c0_25], %26 {strides = array<i32>} : memref<8x1xf32, #tpu.memory_space<vmem>>, vector<8x1xf32>,
    %48 = arith.cmpi eq, %3, %1 : i32
    %49 = arith.extui %48 : i1 to i32
    %c0_i32_26 = arith.constant 0 : i32
    %50 = arith.cmpi ne, %49, %c0_i32_26 : i32
    scf.if %50 {
      %c0_27 = arith.constant 0 : index
      %c0_28 = arith.constant 0 : index
      %51 = vector.load %arg10[%c0_27, %c0_28] : memref<8x8xf32, #tpu.memory_space<vmem>>, vector<8x8xf32>
      %c0_29 = arith.constant 0 : index
      %c0_30 = arith.constant 0 : index
      %52 = vector.load %arg9[%c0_29, %c0_30] : memref<8x1xf32, #tpu.memory_space<vmem>>, vector<8x1xf32>
      %53 = tpu.reciprocal %52 {approx = true} : vector<8x1xf32> -> vector<8x1xf32>
      %54 = vector.broadcast %53 : vector<8x1xf32> to vector<8x8xf32>
      %55 = arith.mulf %51, %54 : vector<8x8xf32>
      %56 = arith.truncf %55 : vector<8x8xf32> to vector<8x8xbf16>
      %c0_31 = arith.constant 0 : index
      %c0_32 = arith.constant 0 : index
      %c0_33 = arith.constant 0 : index
      %57 = vector.load %arg7[%c0_31, %c0_32, %c0_33] : memref<1x8x8xbf16, #tpu.memory_space<vmem>>, vector<1x8x8xbf16>
      %58 = vector.shape_cast %57 : vector<1x8x8xbf16> to vector<8x8xbf16>
      %59 = vector.shape_cast %56 : vector<8x8xbf16> to vector<1x8x8xbf16>
      tpu.vector_store %arg7[%c0_31, %c0_32, %c0_33], %59 {strides = array<i32>} : memref<1x8x8xbf16, #tpu.memory_space<vmem>>, vector<1x8x8xbf16>,
    } else {
    }
    return
  }
  func.func @transform_0(%arg0: i32, %arg1: i32, %arg2: memref<1xi32, #tpu.memory_space<smem>>, %arg3: memref<1xi32, #tpu.memory_space<smem>>) -> (i32, i32, i32) {
    %0 = arith.index_cast %arg1 : i32 to index
    %1 = memref.load %arg2[%0] : memref<1xi32, #tpu.memory_space<smem>>
    %c0_i32 = arith.constant 0 : i32
    %c0_i32_0 = arith.constant 0 : i32
    return %arg0, %1, %c0_i32 : i32, i32, i32
  }
  func.func @transform_1(%arg0: i32, %arg1: i32, %arg2: memref<1xi32, #tpu.memory_space<smem>>, %arg3: memref<1xi32, #tpu.memory_space<smem>>) -> (i32, i32, i32) {
    %0 = arith.index_cast %arg1 : i32 to index
    %1 = memref.load %arg3[%0] : memref<1xi32, #tpu.memory_space<smem>>
    %c0_i32 = arith.constant 0 : i32
    %c0_i32_0 = arith.constant 0 : i32
    return %arg0, %1, %c0_i32 : i32, i32, i32
  }
  func.func @transform_2(%arg0: i32, %arg1: i32, %arg2: memref<1xi32, #tpu.memory_space<smem>>, %arg3: memref<1xi32, #tpu.memory_space<smem>>) -> (i32, i32, i32) {
    %0 = arith.index_cast %arg1 : i32 to index
    %1 = memref.load %arg3[%0] : memref<1xi32, #tpu.memory_space<smem>>
    %c0_i32 = arith.constant 0 : i32
    %c0_i32_0 = arith.constant 0 : i32
    return %arg0, %1, %c0_i32 : i32, i32, i32
  }
  func.func @transform_3(%arg0: i32, %arg1: i32, %arg2: memref<1xi32, #tpu.memory_space<smem>>, %arg3: memref<1xi32, #tpu.memory_space<smem>>) -> (i32, i32, i32) {
    %0 = arith.index_cast %arg1 : i32 to index
    %1 = memref.load %arg2[%0] : memref<1xi32, #tpu.memory_space<smem>>
    %c0_i32 = arith.constant 0 : i32
    %c0_i32_0 = arith.constant 0 : i32
    return %arg0, %1, %c0_i32 : i32, i32, i32
  }
}

module attributes {stable_mosaic.version = 11 : i64} {
  func.func @_matmul_kernel(%arg0: i32, %arg1: i32, %arg2: i32, %arg3: memref<8x32xbf16, #tpu.memory_space<vmem>>, %arg4: memref<32x32xbf16, #tpu.memory_space<vmem>>, %arg5: memref<8x32xbf16, #tpu.memory_space<vmem>>, %arg6: memref<8x32xf32, #tpu.memory_space<vmem>>) attributes {dimension_semantics = [#tpu.dimension_semantics<parallel>, #tpu.dimension_semantics<parallel>, #tpu.dimension_semantics<arbitrary>], iteration_bounds = array<i64: 1, 1, 1>, scalar_prefetch = 0 : i64, scratch_operands = 1 : i64, tpu.core_type = #tpu.core_type<tc>, window_params = [{transform_indices = @transform_0, window_bounds = array<i64: 8, 32>}, {transform_indices = @transform_1, window_bounds = array<i64: 32, 32>}, {transform_indices = @transform_2, window_bounds = array<i64: 8, 32>}]} {
    %c0_i32 = arith.constant 0 : i32
    %0 = arith.cmpi eq, %arg2, %c0_i32 : i32
    %1 = arith.extui %0 : i1 to i32
    %c0_i32_0 = arith.constant 0 : i32
    %2 = arith.cmpi ne, %1, %c0_i32_0 : i32
    scf.if %2 {
      %cst_10 = arith.constant 0.000000e+00 : f32
      %12 = vector.broadcast %cst_10 : f32 to vector<8x32xf32>
      %c0_11 = arith.constant 0 : index
      %c0_12 = arith.constant 0 : index
      %13 = vector.load %arg6[%c0_11, %c0_12] : memref<8x32xf32, #tpu.memory_space<vmem>>, vector<8x32xf32>
      tpu.vector_store %arg6[%c0_11, %c0_12], %12 {strides = array<i32>} : memref<8x32xf32, #tpu.memory_space<vmem>>, vector<8x32xf32>,
    } else {
    }
    %c0 = arith.constant 0 : index
    %c0_1 = arith.constant 0 : index
    %3 = vector.load %arg6[%c0, %c0_1] : memref<8x32xf32, #tpu.memory_space<vmem>>, vector<8x32xf32>
    %c0_2 = arith.constant 0 : index
    %c0_3 = arith.constant 0 : index
    %4 = vector.load %arg3[%c0_2, %c0_3] : memref<8x32xbf16, #tpu.memory_space<vmem>>, vector<8x32xbf16>
    %c0_4 = arith.constant 0 : index
    %c0_5 = arith.constant 0 : index
    %5 = vector.load %arg4[%c0_4, %c0_5] : memref<32x32xbf16, #tpu.memory_space<vmem>>, vector<32x32xbf16>
    %cst = arith.constant dense<0.000000e+00> : vector<8x32xf32>
    %6 = tpu.matmul %4, %5, %cst {dimension_numbers = #tpu.dot_dimension_numbers<[1], [0], [0], [1], [0, 0, 1, 1], [], []>} : vector<8x32xbf16>, vector<32x32xbf16>, vector<8x32xf32> -> vector<8x32xf32>
    %7 = arith.addf %3, %6 : vector<8x32xf32>
    %c0_6 = arith.constant 0 : index
    %c0_7 = arith.constant 0 : index
    %8 = vector.load %arg6[%c0_6, %c0_7] : memref<8x32xf32, #tpu.memory_space<vmem>>, vector<8x32xf32>
    tpu.vector_store %arg6[%c0_6, %c0_7], %7 {strides = array<i32>} : memref<8x32xf32, #tpu.memory_space<vmem>>, vector<8x32xf32>,
    %c0_i32_8 = arith.constant 0 : i32
    %9 = arith.cmpi eq, %arg2, %c0_i32_8 : i32
    %10 = arith.extui %9 : i1 to i32
    %c0_i32_9 = arith.constant 0 : i32
    %11 = arith.cmpi ne, %10, %c0_i32_9 : i32
    scf.if %11 {
      %c0_10 = arith.constant 0 : index
      %c0_11 = arith.constant 0 : index
      %12 = vector.load %arg6[%c0_10, %c0_11] : memref<8x32xf32, #tpu.memory_space<vmem>>, vector<8x32xf32>
      %13 = arith.truncf %12 : vector<8x32xf32> to vector<8x32xbf16>
      %c0_12 = arith.constant 0 : index
      %c0_13 = arith.constant 0 : index
      %14 = vector.load %arg5[%c0_12, %c0_13] : memref<8x32xbf16, #tpu.memory_space<vmem>>, vector<8x32xbf16>
      tpu.vector_store %arg5[%c0_12, %c0_13], %13 {strides = array<i32>} : memref<8x32xbf16, #tpu.memory_space<vmem>>, vector<8x32xbf16>,
    } else {
    }
    return
  }
  func.func @transform_0(%arg0: i32, %arg1: i32, %arg2: i32) -> (i32, i32) {
    %c0_i32 = arith.constant 0 : i32
    return %arg0, %arg2 : i32, i32
  }
  func.func @transform_1(%arg0: i32, %arg1: i32, %arg2: i32) -> (i32, i32) {
    %c0_i32 = arith.constant 0 : i32
    return %arg2, %arg1 : i32, i32
  }
  func.func @transform_2(%arg0: i32, %arg1: i32, %arg2: i32) -> (i32, i32) {
    %c0_i32 = arith.constant 0 : i32
    return %arg0, %arg1 : i32, i32
  }
}

module attributes {stable_mosaic.version = 11 : i64} {
  func.func @_add_rmsnorm_kernel(%arg0: i32, %arg1: memref<8x32xbf16, #tpu.memory_space<vmem>>, %arg2: memref<8x32xbf16, #tpu.memory_space<vmem>>, %arg3: memref<1x32xbf16, #tpu.memory_space<vmem>>, %arg4: memref<8x32xbf16, #tpu.memory_space<vmem>>, %arg5: memref<8x32xbf16, #tpu.memory_space<vmem>>) attributes {dimension_semantics = [#tpu.dimension_semantics<parallel>], iteration_bounds = array<i64: 1>, scalar_prefetch = 0 : i64, scratch_operands = 0 : i64, tpu.core_type = #tpu.core_type<tc>, window_params = [{transform_indices = @transform_0, window_bounds = array<i64: 8, 32>}, {transform_indices = @transform_1, window_bounds = array<i64: 8, 32>}, {pipeline_mode = #tpu.pipeline_mode<synchronous>, transform_indices = @transform_2, window_bounds = array<i64: 1, 32>}, {transform_indices = @transform_3, window_bounds = array<i64: 8, 32>}, {transform_indices = @transform_4, window_bounds = array<i64: 8, 32>}]} {
    %c0 = arith.constant 0 : index
    %c0_0 = arith.constant 0 : index
    %0 = vector.load %arg1[%c0, %c0_0] : memref<8x32xbf16, #tpu.memory_space<vmem>>, vector<8x32xbf16>
    %1 = arith.extf %0 : vector<8x32xbf16> to vector<8x32xf32>
    %c0_1 = arith.constant 0 : index
    %c0_2 = arith.constant 0 : index
    %2 = vector.load %arg2[%c0_1, %c0_2] : memref<8x32xbf16, #tpu.memory_space<vmem>>, vector<8x32xbf16>
    %3 = arith.extf %2 : vector<8x32xbf16> to vector<8x32xf32>
    %4 = arith.addf %1, %3 : vector<8x32xf32>
    %5 = arith.truncf %4 : vector<8x32xf32> to vector<8x32xbf16>
    %c0_3 = arith.constant 0 : index
    %c0_4 = arith.constant 0 : index
    %6 = vector.load %arg5[%c0_3, %c0_4] : memref<8x32xbf16, #tpu.memory_space<vmem>>, vector<8x32xbf16>
    tpu.vector_store %arg5[%c0_3, %c0_4], %5 {strides = array<i32>} : memref<8x32xbf16, #tpu.memory_space<vmem>>, vector<8x32xbf16>,
    %7 = arith.mulf %4, %4 : vector<8x32xf32>
    %cst = arith.constant dense<0.000000e+00> : vector<8xf32>
    %8 = vector.multi_reduction <add>, %7, %cst [1] : vector<8x32xf32> to vector<8xf32>
    %9 = vector.shape_cast %8 : vector<8xf32> to vector<8x1xf32>
    %cst_5 = arith.constant 3.200000e+01 : f32
    %10 = vector.broadcast %cst_5 : f32 to vector<8x1xf32>
    %11 = arith.divf %9, %10 : vector<8x1xf32>
    %cst_6 = arith.constant 9.99999997E-7 : f32
    %12 = vector.broadcast %cst_6 : f32 to vector<8x1xf32>
    %13 = arith.addf %11, %12 : vector<8x1xf32>
    %14 = math.rsqrt %13 : vector<8x1xf32>
    %15 = vector.broadcast %14 : vector<8x1xf32> to vector<8x32xf32>
    %16 = arith.mulf %4, %15 : vector<8x32xf32>
    %c0_7 = arith.constant 0 : index
    %c0_8 = arith.constant 0 : index
    %17 = vector.load %arg3[%c0_7, %c0_8] : memref<1x32xbf16, #tpu.memory_space<vmem>>, vector<1x32xbf16>
    %18 = arith.extf %17 : vector<1x32xbf16> to vector<1x32xf32>
    %19 = vector.broadcast %18 : vector<1x32xf32> to vector<8x32xf32>
    %20 = arith.mulf %16, %19 : vector<8x32xf32>
    %21 = arith.truncf %20 : vector<8x32xf32> to vector<8x32xbf16>
    %c0_9 = arith.constant 0 : index
    %c0_10 = arith.constant 0 : index
    %22 = vector.load %arg4[%c0_9, %c0_10] : memref<8x32xbf16, #tpu.memory_space<vmem>>, vector<8x32xbf16>
    tpu.vector_store %arg4[%c0_9, %c0_10], %21 {strides = array<i32>} : memref<8x32xbf16, #tpu.memory_space<vmem>>, vector<8x32xbf16>,
    return
  }
  func.func @transform_0(%arg0: i32) -> (i32, i32) {
    %c0_i32 = arith.constant 0 : i32
    %c0_i32_0 = arith.constant 0 : i32
    return %arg0, %c0_i32 : i32, i32
  }
  func.func @transform_1(%arg0: i32) -> (i32, i32) {
    %c0_i32 = arith.constant 0 : i32
    %c0_i32_0 = arith.constant 0 : i32
    return %arg0, %c0_i32 : i32, i32
  }
  func.func @transform_2(%arg0: i32) -> (i32, i32) {
    %c0_i32 = arith.constant 0 : i32
    %c0_i32_0 = arith.constant 0 : i32
    %c0_i32_1 = arith.constant 0 : i32
    return %c0_i32, %c0_i32_0 : i32, i32
  }
  func.func @transform_3(%arg0: i32) -> (i32, i32) {
    %c0_i32 = arith.constant 0 : i32
    %c0_i32_0 = arith.constant 0 : i32
    return %arg0, %c0_i32 : i32, i32
  }
  func.func @transform_4(%arg0: i32) -> (i32, i32) {
    %c0_i32 = arith.constant 0 : i32
    %c0_i32_0 = arith.constant 0 : i32
    return %arg0, %c0_i32 : i32, i32
  }
}

module attributes {stable_mosaic.version = 11 : i64} {
  func.func @_gate_up_silu_kernel(%arg0: i32, %arg1: i32, %arg2: i32, %arg3: memref<8x32xbf16, #tpu.memory_space<vmem>>, %arg4: memref<32x64xbf16, #tpu.memory_space<vmem>>, %arg5: memref<32x64xbf16, #tpu.memory_space<vmem>>, %arg6: memref<8x64xbf16, #tpu.memory_space<vmem>>, %arg7: memref<8x64xf32, #tpu.memory_space<vmem>>, %arg8: memref<8x64xf32, #tpu.memory_space<vmem>>) attributes {dimension_semantics = [#tpu.dimension_semantics<parallel>, #tpu.dimension_semantics<parallel>, #tpu.dimension_semantics<arbitrary>], iteration_bounds = array<i64: 1, 1, 1>, scalar_prefetch = 0 : i64, scratch_operands = 2 : i64, tpu.core_type = #tpu.core_type<tc>, window_params = [{transform_indices = @transform_0, window_bounds = array<i64: 8, 32>}, {transform_indices = @transform_1, window_bounds = array<i64: 32, 64>}, {transform_indices = @transform_2, window_bounds = array<i64: 32, 64>}, {transform_indices = @transform_3, window_bounds = array<i64: 8, 64>}]} {
    %c0_i32 = arith.constant 0 : i32
    %0 = arith.cmpi eq, %arg2, %c0_i32 : i32
    %1 = arith.extui %0 : i1 to i32
    %c0_i32_0 = arith.constant 0 : i32
    %2 = arith.cmpi ne, %1, %c0_i32_0 : i32
    scf.if %2 {
      %cst_17 = arith.constant 0.000000e+00 : f32
      %17 = vector.broadcast %cst_17 : f32 to vector<8x64xf32>
      %c0_18 = arith.constant 0 : index
      %c0_19 = arith.constant 0 : index
      %18 = vector.load %arg7[%c0_18, %c0_19] : memref<8x64xf32, #tpu.memory_space<vmem>>, vector<8x64xf32>
      tpu.vector_store %arg7[%c0_18, %c0_19], %17 {strides = array<i32>} : memref<8x64xf32, #tpu.memory_space<vmem>>, vector<8x64xf32>,
      %cst_20 = arith.constant 0.000000e+00 : f32
      %19 = vector.broadcast %cst_20 : f32 to vector<8x64xf32>
      %c0_21 = arith.constant 0 : index
      %c0_22 = arith.constant 0 : index
      %20 = vector.load %arg8[%c0_21, %c0_22] : memref<8x64xf32, #tpu.memory_space<vmem>>, vector<8x64xf32>
      tpu.vector_store %arg8[%c0_21, %c0_22], %19 {strides = array<i32>} : memref<8x64xf32, #tpu.memory_space<vmem>>, vector<8x64xf32>,
    } else {
    }
    %c0 = arith.constant 0 : index
    %c0_1 = arith.constant 0 : index
    %3 = vector.load %arg3[%c0, %c0_1] : memref<8x32xbf16, #tpu.memory_space<vmem>>, vector<8x32xbf16>
    %c0_2 = arith.constant 0 : index
    %c0_3 = arith.constant 0 : index
    %4 = vector.load %arg7[%c0_2, %c0_3] : memref<8x64xf32, #tpu.memory_space<vmem>>, vector<8x64xf32>
    %c0_4 = arith.constant 0 : index
    %c0_5 = arith.constant 0 : index
    %5 = vector.load %arg4[%c0_4, %c0_5] : memref<32x64xbf16, #tpu.memory_space<vmem>>, vector<32x64xbf16>
    %cst = arith.constant dense<0.000000e+00> : vector<8x64xf32>
    %6 = tpu.matmul %3, %5, %cst {dimension_numbers = #tpu.dot_dimension_numbers<[1], [0], [0], [1], [0, 0, 1, 1], [], []>} : vector<8x32xbf16>, vector<32x64xbf16>, vector<8x64xf32> -> vector<8x64xf32>
    %7 = arith.addf %4, %6 : vector<8x64xf32>
    %c0_6 = arith.constant 0 : index
    %c0_7 = arith.constant 0 : index
    %8 = vector.load %arg7[%c0_6, %c0_7] : memref<8x64xf32, #tpu.memory_space<vmem>>, vector<8x64xf32>
    tpu.vector_store %arg7[%c0_6, %c0_7], %7 {strides = array<i32>} : memref<8x64xf32, #tpu.memory_space<vmem>>, vector<8x64xf32>,
    %c0_8 = arith.constant 0 : index
    %c0_9 = arith.constant 0 : index
    %9 = vector.load %arg8[%c0_8, %c0_9] : memref<8x64xf32, #tpu.memory_space<vmem>>, vector<8x64xf32>
    %c0_10 = arith.constant 0 : index
    %c0_11 = arith.constant 0 : index
    %10 = vector.load %arg5[%c0_10, %c0_11] : memref<32x64xbf16, #tpu.memory_space<vmem>>, vector<32x64xbf16>
    %cst_12 = arith.constant dense<0.000000e+00> : vector<8x64xf32>
    %11 = tpu.matmul %3, %10, %cst_12 {dimension_numbers = #tpu.dot_dimension_numbers<[1], [0], [0], [1], [0, 0, 1, 1], [], []>} : vector<8x32xbf16>, vector<32x64xbf16>, vector<8x64xf32> -> vector<8x64xf32>
    %12 = arith.addf %9, %11 : vector<8x64xf32>
    %c0_13 = arith.constant 0 : index
    %c0_14 = arith.constant 0 : index
    %13 = vector.load %arg8[%c0_13, %c0_14] : memref<8x64xf32, #tpu.memory_space<vmem>>, vector<8x64xf32>
    tpu.vector_store %arg8[%c0_13, %c0_14], %12 {strides = array<i32>} : memref<8x64xf32, #tpu.memory_space<vmem>>, vector<8x64xf32>,
    %c0_i32_15 = arith.constant 0 : i32
    %14 = arith.cmpi eq, %arg2, %c0_i32_15 : i32
    %15 = arith.extui %14 : i1 to i32
    %c0_i32_16 = arith.constant 0 : i32
    %16 = arith.cmpi ne, %15, %c0_i32_16 : i32
    scf.if %16 {
      %c0_17 = arith.constant 0 : index
      %c0_18 = arith.constant 0 : index
      %17 = vector.load %arg7[%c0_17, %c0_18] : memref<8x64xf32, #tpu.memory_space<vmem>>, vector<8x64xf32>
      %18 = arith.negf %17 : vector<8x64xf32>
      %19 = math.exp %18 : vector<8x64xf32>
      %cst_19 = arith.constant 1.000000e+00 : f32
      %20 = vector.broadcast %cst_19 : f32 to vector<8x64xf32>
      %21 = arith.addf %20, %19 : vector<8x64xf32>
      %22 = arith.divf %20, %21 : vector<8x64xf32>
      %23 = arith.mulf %17, %22 : vector<8x64xf32>
      %c0_20 = arith.constant 0 : index
      %c0_21 = arith.constant 0 : index
      %24 = vector.load %arg8[%c0_20, %c0_21] : memref<8x64xf32, #tpu.memory_space<vmem>>, vector<8x64xf32>
      %25 = arith.mulf %23, %24 : vector<8x64xf32>
      %26 = arith.truncf %25 : vector<8x64xf32> to vector<8x64xbf16>
      %c0_22 = arith.constant 0 : index
      %c0_23 = arith.constant 0 : index
      %27 = vector.load %arg6[%c0_22, %c0_23] : memref<8x64xbf16, #tpu.memory_space<vmem>>, vector<8x64xbf16>
      tpu.vector_store %arg6[%c0_22, %c0_23], %26 {strides = array<i32>} : memref<8x64xbf16, #tpu.memory_space<vmem>>, vector<8x64xbf16>,
    } else {
    }
    return
  }
  func.func @transform_0(%arg0: i32, %arg1: i32, %arg2: i32) -> (i32, i32) {
    %c0_i32 = arith.constant 0 : i32
    return %arg0, %arg2 : i32, i32
  }
  func.func @transform_1(%arg0: i32, %arg1: i32, %arg2: i32) -> (i32, i32) {
    %c0_i32 = arith.constant 0 : i32
    return %arg2, %arg1 : i32, i32
  }
  func.func @transform_2(%arg0: i32, %arg1: i32, %arg2: i32) -> (i32, i32) {
    %c0_i32 = arith.constant 0 : i32
    return %arg2, %arg1 : i32, i32
  }
  func.func @transform_3(%arg0: i32, %arg1: i32, %arg2: i32) -> (i32, i32) {
    %c0_i32 = arith.constant 0 : i32
    return %arg0, %arg1 : i32, i32
  }
}

module attributes {stable_mosaic.version = 11 : i64} {
  func.func @_matmul_kernel(%arg0: i32, %arg1: i32, %arg2: i32, %arg3: memref<8x64xbf16, #tpu.memory_space<vmem>>, %arg4: memref<64x32xbf16, #tpu.memory_space<vmem>>, %arg5: memref<8x32xbf16, #tpu.memory_space<vmem>>, %arg6: memref<8x32xf32, #tpu.memory_space<vmem>>) attributes {dimension_semantics = [#tpu.dimension_semantics<parallel>, #tpu.dimension_semantics<parallel>, #tpu.dimension_semantics<arbitrary>], iteration_bounds = array<i64: 1, 1, 1>, scalar_prefetch = 0 : i64, scratch_operands = 1 : i64, tpu.core_type = #tpu.core_type<tc>, window_params = [{transform_indices = @transform_0, window_bounds = array<i64: 8, 64>}, {transform_indices = @transform_1, window_bounds = array<i64: 64, 32>}, {transform_indices = @transform_2, window_bounds = array<i64: 8, 32>}]} {
    %c0_i32 = arith.constant 0 : i32
    %0 = arith.cmpi eq, %arg2, %c0_i32 : i32
    %1 = arith.extui %0 : i1 to i32
    %c0_i32_0 = arith.constant 0 : i32
    %2 = arith.cmpi ne, %1, %c0_i32_0 : i32
    scf.if %2 {
      %cst_10 = arith.constant 0.000000e+00 : f32
      %12 = vector.broadcast %cst_10 : f32 to vector<8x32xf32>
      %c0_11 = arith.constant 0 : index
      %c0_12 = arith.constant 0 : index
      %13 = vector.load %arg6[%c0_11, %c0_12] : memref<8x32xf32, #tpu.memory_space<vmem>>, vector<8x32xf32>
      tpu.vector_store %arg6[%c0_11, %c0_12], %12 {strides = array<i32>} : memref<8x32xf32, #tpu.memory_space<vmem>>, vector<8x32xf32>,
    } else {
    }
    %c0 = arith.constant 0 : index
    %c0_1 = arith.constant 0 : index
    %3 = vector.load %arg6[%c0, %c0_1] : memref<8x32xf32, #tpu.memory_space<vmem>>, vector<8x32xf32>
    %c0_2 = arith.constant 0 : index
    %c0_3 = arith.constant 0 : index
    %4 = vector.load %arg3[%c0_2, %c0_3] : memref<8x64xbf16, #tpu.memory_space<vmem>>, vector<8x64xbf16>
    %c0_4 = arith.constant 0 : index
    %c0_5 = arith.constant 0 : index
    %5 = vector.load %arg4[%c0_4, %c0_5] : memref<64x32xbf16, #tpu.memory_space<vmem>>, vector<64x32xbf16>
    %cst = arith.constant dense<0.000000e+00> : vector<8x32xf32>
    %6 = tpu.matmul %4, %5, %cst {dimension_numbers = #tpu.dot_dimension_numbers<[1], [0], [0], [1], [0, 0, 1, 1], [], []>} : vector<8x64xbf16>, vector<64x32xbf16>, vector<8x32xf32> -> vector<8x32xf32>
    %7 = arith.addf %3, %6 : vector<8x32xf32>
    %c0_6 = arith.constant 0 : index
    %c0_7 = arith.constant 0 : index
    %8 = vector.load %arg6[%c0_6, %c0_7] : memref<8x32xf32, #tpu.memory_space<vmem>>, vector<8x32xf32>
    tpu.vector_store %arg6[%c0_6, %c0_7], %7 {strides = array<i32>} : memref<8x32xf32, #tpu.memory_space<vmem>>, vector<8x32xf32>,
    %c0_i32_8 = arith.constant 0 : i32
    %9 = arith.cmpi eq, %arg2, %c0_i32_8 : i32
    %10 = arith.extui %9 : i1 to i32
    %c0_i32_9 = arith.constant 0 : i32
    %11 = arith.cmpi ne, %10, %c0_i32_9 : i32
    scf.if %11 {
      %c0_10 = arith.constant 0 : index
      %c0_11 = arith.constant 0 : index
      %12 = vector.load %arg6[%c0_10, %c0_11] : memref<8x32xf32, #tpu.memory_space<vmem>>, vector<8x32xf32>
      %13 = arith.truncf %12 : vector<8x32xf32> to vector<8x32xbf16>
      %c0_12 = arith.constant 0 : index
      %c0_13 = arith.constant 0 : index
      %14 = vector.load %arg5[%c0_12, %c0_13] : memref<8x32xbf16, #tpu.memory_space<vmem>>, vector<8x32xbf16>
      tpu.vector_store %arg5[%c0_12, %c0_13], %13 {strides = array<i32>} : memref<8x32xbf16, #tpu.memory_space<vmem>>, vector<8x32xbf16>,
    } else {
    }
    return
  }
  func.func @transform_0(%arg0: i32, %arg1: i32, %arg2: i32) -> (i32, i32) {
    %c0_i32 = arith.constant 0 : i32
    return %arg0, %arg2 : i32, i32
  }
  func.func @transform_1(%arg0: i32, %arg1: i32, %arg2: i32) -> (i32, i32) {
    %c0_i32 = arith.constant 0 : i32
    return %arg2, %arg1 : i32, i32
  }
  func.func @transform_2(%arg0: i32, %arg1: i32, %arg2: i32) -> (i32, i32) {
    %c0_i32 = arith.constant 0 : i32
    return %arg0, %arg1 : i32, i32
  }
}

</mosaic_0001>

<bundles_post_ra>
// kernel: qwen_block.8
= control target key start
LH: loop header
LB: loop body
LE: loop exit
PB: predicated region body
PF: predicated region fallthrough
CT: control target
= control target key end

     0   :  { %vm19_vm0 = vcmask 785408   ;;  %v122_v0 = vmov 0.0   ;;  %vm123_vm1 = vmmov 0   ;;  %vm39_vm2 = vcmask 261120   ;;  %s161_s1 = inlined_call_operand.vmem [shape: bf16[32,96], index: 1, kind: input, shape index: {}]   ;;  %s162_s0 = inlined_call_operand.vmem [shape: bf16[8,32], index: 0, kind: input, shape index: {}]   ;;  %s163_s2 = inlined_call_operand.vmem [shape: bf16[1,96], index: 2, kind: input, shape index: {}]   ;;  %s164_s3 = inlined_call_operand.vmem [shape: bf16[8,96], index: 3, kind: output, shape index: {}]  }
   0x1   :  { %20 = vst.msk [vmem:[#allocation2] sm:$0xff] %vm19_vm0, %v122_v0  ;;  %110 = vmatprep.subr.bf16.mxu0 %v122_v0  ;;  %v120_v1 = vld [vmem:[%s161_s1 + $0x8] sm:$0xff]   ;;  %114 = vmatprep.mubr.msk.bf16.mxu0 %vm123_vm1, %v122_v0  ;;  %v121_v2 = vld [vmem:[%s161_s1] sm:$0xff]   ;;  %v92_v4 = vlaneseq  ;;  %vm98_vm3 = vcmask 781312  }
   0x2   :  { %111 = vmatpush3.bf16.msra.mxu0 %v120_v1  ;;  %v22_v3 = vld [vmem:[%s162_s0] sm:$0xf] }
   0x3   :  { %112 = vmatprep.subr.bf16.mxu0 %v122_v0  ;;  %v93_v6 = vshrl.u32 %v92_v4, 7  ;;  %v90_v8 = vld [vmem:[%s163_s2] sm:$0x1] }
   0x4   :  { %v91_v11 = vunpack.c.l.bf16 %v90_v8 }
   0x5   :  { %v94_v12 = vsub.s32 0, %v93_v6 }
   0x6   :  { %113 = vmatpush3.bf16.msra.mxu0 %v121_v2 }
   0x7   :  { %v95_v15 = vrot.slane %v91_v11, %v94_v12 }
   0x8   :  { %v21_v5 = vld [vmem:[#allocation2] sm:$0xff] }
   0x9   :  { %115 = vmatmul.mubr.msk.bf16.vlgmr.msra.gmra.mxu0 %vm39_vm2, %v22_v3 }
  0xc9   :  { %v77_v7 = vpop.f32.mrf.mxu0 }
  0xca   :  { %v83_v9 = vadd.f32 %v77_v7, %v21_v5 }
  0xcb   :  { %v116_v10 = vpop.f32.mrf.mxu0 }
  0xcc   :  { %85 = vst.msk [vmem:[#allocation2] sm:$0xff] %vm19_vm0, %v83_v9 }
  0xcd   :  { %v80_v13 = vpop.f32.mrf.mxu0 }
  0xcf   :  { %v117_v14 = vpop.f32.mrf.mxu0 }
  0xd3   :  { %v89_v16 = vld [vmem:[#allocation2] sm:$0xff] }
  0xd4   :  { %v96_v17 = vadd.f32 %v95_v15, %v89_v16 }
  0xd6   :  { %v97_v18 = vpack.c.bf16 %v96_v17, %v96_v17 }
  0xd8   :  { %99 = vst.msk [vmem:[%s164_s3] sm:$0xf] %vm98_vm3, %v97_v18 }

// kernel: qwen_block.7
= control target key start
LH: loop header
LB: loop body
LE: loop exit
PB: predicated region body
PF: predicated region fallthrough
CT: control target
= control target key end

     0   :  { %vm14_vm0 = vcmask 261120   ;;  %v25_v7 = vlaneseq  ;;  %vm31_vm1 = vcmask 257024   ;;  %s63_s0 = inlined_call_operand.vmem [shape: bf16[8,32], index: 0, kind: input, shape index: {}]   ;;  %s64_s1 = inlined_call_operand.vmem [shape: bf16[1,32], index: 1, kind: input, shape index: {}]   ;;  %s65_s2 = inlined_call_operand.vmem [shape: bf16[8,32], index: 2, kind: output, shape index: {}]  }
   0x1   :  { %v11_v0 = vld [vmem:[%s63_s0] sm:$0xf] }
   0x2   :  { %v12_v1 = vunpack.c.l.bf16 %v11_v0  ;;  %v26_v8 = vshrl.u32 %v25_v7, 7  ;;  %v23_v9 = vld [vmem:[%s64_s1] sm:$0x1] }
   0x3   :  { %v24_v10 = vunpack.c.l.bf16 %v23_v9 }
   0x4   :  { %v13_v2 = vmul.f32 %v12_v1, %v12_v1  ;;  %v27_v11 = vsub.s32 0, %v26_v8 }
   0x6   :  { %v15_v3 = vsel %vm14_vm0, %v13_v2, 0.0  ;;  %v28_v12 = vrot.slane %v24_v10, %v27_v11 }
   0x7   :  { %16 = vadd.xlane.f32.xlu0 %v15_v3 }
  0x90   :  { %v17_v4 = vpop.xlane.xlu0 %16 }
  0x91   :  { %v19_v5 = vmul.f32 0.03125, %v17_v4 }
  0x93   :  { %v20_v6 = vadd.f32 1e-06, %v19_v5 }
  0x95   :  { %37 = vrsqrt.f32 %v20_v6 }
  0xa2   :  { %v38_v13 = vpop.eup %37 }
  0xa3   :  { %v22_v14 = vmul.f32 %v38_v13, %v12_v1 }
  0xa5   :  { %v29_v15 = vmul.f32 %v28_v12, %v22_v14 }
  0xa7   :  { %v30_v16 = vpack.c.bf16 %v29_v15, %v29_v15 }
  0xa9   :  { %32 = vst.msk [vmem:[%s65_s2] sm:$0xf] %vm31_vm1, %v30_v16 }

// kernel: qwen_block.10
= control target key start
LH: loop header
LB: loop body
LE: loop exit
PB: predicated region body
PF: predicated region fallthrough
CT: control target
= control target key end

     0   :  { %vm16_vm0 = vcmask 261120   ;;  %v111_v0 = vmov 0.0   ;;  %vm112_vm1 = vmmov 0   ;;  %vm87_vm2 = vcmask 257024   ;;  %s143_s1 = inlined_call_operand.vmem [shape: bf16[32,32], index: 1, kind: input, shape index: {}]   ;;  %s144_s0 = inlined_call_operand.vmem [shape: bf16[8,32], index: 0, kind: input, shape index: {}]   ;;  %s145_s2 = inlined_call_operand.vmem [shape: bf16[8,32], index: 2, kind: output, shape index: {}]  }
   0x1   :  { %99 = vmatprep.subr.bf16.mxu0 %v111_v0  ;;  %v109_v1 = vld [vmem:[%s143_s1 + $0x8] sm:$0xff]   ;;  %103 = vmatprep.mubr.msk.bf16.mxu0 %vm112_vm1, %v111_v0  ;;  %17 = vst.msk [vmem:[#allocation2] sm:$0xff] %vm16_vm0, %v111_v0  ;;  %v110_v2 = vld [vmem:[%s143_s1] sm:$0xff]  }
   0x2   :  { %100 = vmatpush3.bf16.msra.mxu0 %v109_v1  ;;  %v19_v3 = vld [vmem:[%s144_s0] sm:$0xf] }
   0x3   :  { %101 = vmatprep.subr.bf16.mxu0 %v111_v0 }
   0x6   :  { %102 = vmatpush3.bf16.msra.mxu0 %v110_v2 }
   0x8   :  { %v18_v4 = vld [vmem:[#allocation2] sm:$0xff] }
   0x9   :  { %104 = vmatmul.mubr.msk.bf16.vlgmr.msra.gmra.mxu0 %vm16_vm0, %v19_v3 }
  0xc9   :  { %v74_v5 = vpop.f32.mrf.mxu0 }
  0xca   :  { %v80_v6 = vadd.f32 %v74_v5, %v18_v4 }
  0xcb   :  { %v105_v7 = vpop.f32.mrf.mxu0 }
  0xcc   :  { %81 = vst.msk [vmem:[#allocation2] sm:$0xff] %vm16_vm0, %v80_v6 }
  0xcd   :  { %v77_v8 = vpop.f32.mrf.mxu0 }
  0xcf   :  { %v106_v9 = vpop.f32.mrf.mxu0 }
  0xd3   :  { %v85_v10 = vld [vmem:[#allocation2] sm:$0xff] }
  0xd4   :  { %v86_v11 = vpack.c.bf16 %v85_v10, %v85_v10 }
  0xd6   :  { %88 = vst.msk [vmem:[%s145_s2] sm:$0xf] %vm87_vm2, %v86_v11 }

// kernel: qwen_block.9
= control target key start
LH: loop header
LB: loop body
LE: loop exit
PB: predicated region body
PF: predicated region fallthrough
CT: control target
= control target key end

     0   :  { %s701_s22 = smov 0   ;;  %s703_s23 = smov 0   ;;  %s779_s0 = inlined_call_operand.<no memory space> [shape: s32[1], index: 0, kind: input, shape index: {}, may-alias: {0,1}]   ;;  %s780_s1 = inlined_call_operand.<no memory space> [shape: s32[1], index: 1, kind: input, shape index: {}, may-alias: {0,1}]   ;;  %s781_s2 = inlined_call_operand.vmem [shape: bf16[4,8,8], index: 2, kind: input, shape index: {}]   ;;  %s782_s3 = inlined_call_operand.vmem [shape: bf16[4,8,8], index: 3, kind: input, shape index: {}]   ;;  %s783_s4 = inlined_call_operand.vmem [shape: bf16[4,8,8], index: 4, kind: input, shape index: {}]   ;;  %s784_s5 = inlined_call_operand.vmem [shape: bf16[4,8,8], index: 5, kind: output, shape index: {}]  }
   0x1   :  { %10 = sst [smem:[#allocation6]] %s779_s0  ;;  %s705_s24 = smov 0  }
   0x2   :  { %11 = sst [smem:[#allocation7]] %s780_s1 }
   0x3 LB: > { %s29_s0 = sadd.s32 1, %s653_s23  ;;  %p567_p0 = scmp.ge.s32.totalorder %s657_s24, 1  ;;  %s657_s24 = sphi %s705_s24, %s17_s24   ;;  %s653_s23 = sphi %s703_s23, %s786_s23   ;;  %s649_s22 = sphi %s701_s22, %s785_s22  }
   0x4   : > { %p31_p1 = scmp.ge.s32.totalorder %s29_s0, 4  ;;  %p201_p2 = scmp.lt.s32.totalorder %s657_s24, 5 }
   0x6   : > { %s788_s0 = smov (%p31_p1, %s29_s0), 0  ;;  %p202_p3 = pnand %p567_p0, %p201_p2 }
   0x7   : > { %s719_s1 = sld [smem:[#allocation6]] (!%p202_p3)  ;;  %p248_p4 = scmp.lt.s32.totalorder (!%p202_p3), %s649_s22, 3 }
   0x8   : > { %205 = sbr.rel (%p202_p3) target bundleno = 856 (0x358), region = 32  ;;  %s721_s25 = sld [smem:[#allocation7]] (!%p202_p3) }
   0xd   : > { %s790_s22 = smov (!%p248_p4, %s649_s22), 3  ;;  %p250_p5 = scmp.lt.s32.totalorder %s719_s1, 0 }
   0xe   : > { %p259_p6 = scmp.lt.s32.totalorder %s721_s25, 0  ;;  %p572_p7 = scmp.ne.s32.totalorder %s721_s25, 0 }
   0xf   : > { %s251_s26 = scalar_select %p250_p5, %s719_s1, 0 }
  0x10   : > { %s260_s27 = scalar_select %p259_p6, %s721_s25, 0 }
  0x11   : > { %s252_s28 = sadd.s32 %s251_s26, %s790_s22  ;;  %289 = sbr.rel (%p572_p7) target bundleno = 25 (0x19), region = 36 }
  0x12   : > { %s727_s29 = sshll.u32 %s252_s28, 2  ;;  %s261_s30 = sadd.s32 %s260_s27, %s790_s22 }
  0x13   : > { %s254_s8 = scalar_lea.vmem %s781_s2, %s727_s29  ;;  %s733_s9 = sshll.u32 %s261_s30, 2 }
  0x14   : > { %s263_s12 = scalar_lea.vmem %s782_s3, %s733_s9  ;;  %s272_s15 = scalar_lea.vmem %s783_s4, %s733_s9 }
  0x15   : > { %s281_s18 = scalar_lea.vmem %s784_s5, %s727_s29 }
  0x16   : > { %vm290_vm0 = vcmask 7168   ;;  %vm293_vm1 = vcmask 64512   ;;  %v659_v0 = vmov -inf   ;;  %v660_v1 = vmov 0.0  }
  0x17   : > { %291 = vst.msk [vmem:[#allocation2] sm:$0xff] %vm290_vm0, %v659_v0  ;;  %292 = vst.msk [vmem:[#allocation3] sm:$0xff] %vm290_vm0, %v660_v1 }
  0x18   : > { %294 = vst.msk [vmem:[#allocation4] sm:$0xff] %vm293_vm1, %v660_v1 }
  0x19 PF: > { %v296_v2 = vld [vmem:[%s263_s12] sm:$0xf]  ;;  %vm297_vm2 = vcmask 64512   ;;  %v661_v3 = vmov 0.0   ;;  %vm662_vm3 = vmmov 0   ;;  %v345_v6 = vlaneseq  ;;  %s574_s19 = sshll.u32 %s719_s1, 3  ;;  %p577_p8 = scmp.ne.s32.totalorder %s721_s25, %s719_s1 }
  0x1a   : > { %584 = vmatprep.subr.bf16.mxu0 %v661_v3  ;;  %v302_v4 = vsel %vm297_vm2, %v296_v2, 0  ;;  %586 = vmatprep.mubr.msk.bf16.mxu0 %vm662_vm3, %v661_v3  ;;  %v295_v5 = vld [vmem:[%s254_s8] sm:$0xf]  ;;  %s575_s20 = sshll.u32 %s721_s25, 3  ;;  %v347_v9 = vstv %s574_s19  ;;  %v663_v19 = vmov 0   ;;  %vm378_vm5 = vcmask 7168  }
  0x1b   : > { %585 = vmatpush3.bf16.xpose.msra.mxu0 %v302_v4  ;;  %590 = vmatprep.subr.bf16.mxu1 %v661_v3  ;;  %v346_v7 = vshrl.u32 %v345_v6, 7  ;;  %v351_v8 = vand.u32 127, %v345_v6  ;;  %v352_v10 = vstv %s575_s20  ;;  %v388_v24 = vld [vmem:[%s272_s15] sm:$0xf]  ;;  %vm392_vm6 = vcmask 1043456  }
  0x1c   : > { %592 = vmatprep.mubr.msk.bf16.mxu1 %vm662_vm3, %v661_v3  ;;  %626 = vset.pattern.permute.xlu0 %v663_v19  ;;  %v394_v25 = vsel %vm392_vm6, %v388_v24, 0 }
  0x1d   : > { %v348_v11 = vadd.s32 %v347_v9, %v346_v7  ;;  %v353_v12 = vadd.s32 %v352_v10, %v351_v8  ;;  %627 = vset.pattern.permute.xlu1 %v663_v19  ;;  %591 = vmatpush3.bf16.msra.mxu1 %v394_v25 }
  0x1e   : > { %v356_v20 = vld [vmem:[#allocation2] sm:$0xff]  ;;  %v372_v34 = vld [vmem:[#allocation3] sm:$0xff] }
  0x1f   : > { %vm354_vm4 = vcmp.le.s32.totalorder %v353_v12, %v348_v11  ;;  %v380_v38 = vld [vmem:[#allocation4] sm:$0xff] }
  0x22   : > { %587 = vmatmul.mubr.msk.bf16.vlgmr.msra.gmra.mxu0 %vm297_vm2, %v295_v5 }
  0xe2   : > { %v338_v13 = vpop.f32.mrf.mxu0 }
  0xe3   : > { %v355_v14 = vsel %vm354_vm4, %v338_v13, -1e+30 }
  0xe4   : > { %v588_v15 = vpop.f32.mrf.mxu0  ;;  %v357_v16 = vsel %vm297_vm2, %v355_v14, -inf }
  0xe5   : > { %358 = vmax.xlane.f32.xlu0 %v357_v16 }
  0xe6   : > { %v341_v17 = vpop.f32.mrf.mxu0 }
  0xe8   : > { %v589_v18 = vpop.f32.mrf.mxu0 }
 0x16e   : > { %v359_v21 = vpop.xlane.xlu0 %358 }
 0x16f   : > { %v360_v22 = vmax.f32 %v356_v20, %v359_v21 }
 0x171   : > { %v361_v23 = vsub.f32 %v356_v20, %v360_v22  ;;  %438 = vst.msk [vmem:[#allocation2] sm:$0xff] %vm378_vm5, %v360_v22  ;;  %366 = vperm.xlu0 %626, %v360_v22  }
 0x173   : > { %v362_v30 = vmul.f32 1.442695, %v361_v23 }
 0x1ec   : > { %v367_v26 = vpop.permute.xlu0 %366 }
 0x1ed   : > { %v369_v27 = vsub.f32 %v355_v14, %v367_v26 }
 0x1ef   : > { %v370_v28 = vmul.f32 1.442695, %v369_v27 }
 0x1f1   : > { %628 = vpow2.f32 %v370_v28 }
 0x1f2   : > { %630 = vpow2.f32 %v362_v30 }
 0x1fe   : > { %v629_v29 = vpop.eup %628 }
 0x1ff   : > { %v374_v31 = vsel %vm297_vm2, %v629_v29, 0.0  ;;  %v387_v32 = vpack.c.bf16 %v629_v29, %v629_v29  ;;  %v631_v33 = vpop.eup %630 }
 0x200   : > { %375 = vadd.xlane.f32.xlu1 %v374_v31  ;;  %v373_v35 = vmul.f32 %v631_v33, %v372_v34 }
 0x201   : > { %593 = vmatmul.mubr.msk.bf16.vlgmr.msra.gmra.mxu1 %vm297_vm2, %v387_v32 }
 0x211   : > { %383 = vperm.xlu1 %627, %v631_v33  }
 0x289   : > { %v376_v36 = vpop.xlane.xlu1 %375 }
 0x28a   : > { %v377_v37 = vadd.f32 %v376_v36, %v373_v35 }
 0x28c   : > { %379 = vst.msk [vmem:[#allocation3] sm:$0xff] %vm378_vm5, %v377_v37 }
 0x28d   : > { %v384_v39 = vpop.permute.xlu1 %383 }
 0x28e   : > { %v386_v40 = vmul.f32 %v384_v39, %v380_v38 }
 0x2c1   : > { %v430_v41 = vpop.f32.mrf.mxu1 }
 0x2c2   : > { %v436_v42 = vadd.f32 %v430_v41, %v386_v40 }
 0x2c3   : > { %v594_v43 = vpop.f32.mrf.mxu1  ;;  %442 = sbr.rel (%p577_p8) target bundleno = 856 (0x358), region = 40 }
 0x2c4   : > { %437 = vst.msk [vmem:[#allocation4] sm:$0xff] %vm297_vm2, %v436_v42 }
 0x2c5   : > { %v433_v44 = vpop.f32.mrf.mxu1 }
 0x2c7   : > { %v595_v45 = vpop.f32.mrf.mxu1 }
 0x2c8   : > { %v444_v46 = vld [vmem:[#allocation3] sm:$0xff]  ;;  %v664_v47 = vmov 0   ;;  %vm453_vm7 = vcmask 60416  }
 0x2c9   : > { %632 = vset.pattern.permute.xlu0 %v664_v47  ;;  %633 = vrcp.f32 %v444_v46 }
 0x2cb   : > { %v443_v49 = vld [vmem:[#allocation4] sm:$0xff] }
 0x2d6   : > { %v634_v48 = vpop.eup %633 }
 0x2d7   : > { %448 = vperm.xlu0 %632, %v634_v48  }
 0x352   : > { %v449_v50 = vpop.permute.xlu0 %448 }
 0x353   : > { %v451_v51 = vmul.f32 %v449_v50, %v443_v49 }
 0x355   : > { %v452_v52 = vpack.c.bf16 %v451_v51, %v451_v51 }
 0x357   : > { %454 = vst.msk [vmem:[%s281_s18] sm:$0xf] %vm453_vm7, %v452_v52 }
 0x358 PF: > { %s17_s24 = sadd.s32 1, %s657_s24   ;;  %s785_s22 = smov %s653_s23 }
 0x359   : > { %p14_p9 = scmp.ge.s32.totalorder %s17_s24, 6   ;;  %s786_s23 = smov %s788_s0 }
 0x35b   :  { %16 = sbr.rel (!%p14_p9) target bundleno = 3 (0x3), region = 76 }

// kernel: qwen_block.11
= control target key start
LH: loop header
LB: loop body
LE: loop exit
PB: predicated region body
PF: predicated region fallthrough
CT: control target
= control target key end

     0   :  { %s130_s0 = inlined_call_operand.vmem [shape: bf16[8,32], index: 0, kind: input, shape index: {}]   ;;  %s131_s1 = inlined_call_operand.vmem [shape: bf16[8,32], index: 1, kind: input, shape index: {}]   ;;  %s132_s2 = inlined_call_operand.vmem [shape: bf16[1,32], index: 2, kind: input, shape index: {}]   ;;  %s133_s3 = inlined_call_operand.vmem [shape: bf16[8,32], index: 3, kind: output, shape index: {0}]   ;;  %s134_s4 = inlined_call_operand.hbm [shape: bf16[8,32], index: 4, kind: output, shape index: {1}]  }
   0x1   :  { %v17_v0 = vld [vmem:[%s130_s0] sm:$0xf] }
   0x2   :  { %v19_v1 = vld [vmem:[%s131_s1] sm:$0xf]  ;;  %v18_v2 = vunpack.c.l.bf16 %v17_v0 }
   0x3   :  { %v20_v3 = vunpack.c.l.bf16 %v19_v1 }
   0x4   :  { %10 = vsyncpa [#allocation3], 0  ;;  %vm26_vm0 = vcmask 261120   ;;  %vm23_vm1 = vcmask 257024   ;;  %s87_s19 = smov [#allocation2]  }
   0x5   :  { %v21_v4 = vadd.f32 %v20_v3, %v18_v2  ;;  %s52_s20 = sshll.u32 %s87_s19, 4  ;;  %s53_s20 = int_to_ptr.vmem [resolvable:$true] %s52_s20 }
   0x6   :  { %s65_s0 = scalar_lea.vmem %s53_s20, 64  ;;  %p70_p1 = scmp.lt.s32.totalorder %s53_s20, %s53_s20 }
   0x7   :  { %v25_v5 = vmul.f32 %v21_v4, %v21_v4  ;;  %v22_v7 = vpack.c.bf16 %v21_v4, %v21_v4  ;;  %p66_p0 = scmp.ne.s32.totalorder %s53_s20, %s65_s0  ;;  %p71_p2 = scmp.lt.s32.totalorder %s65_s0, %s65_s0 }
   0x9   :  { %v27_v6 = vsel %vm26_vm0, %v25_v5, 0.0  ;;  %24 = vst.msk [vmem:[#allocation2] sm:$0xf] %vm23_vm1, %v22_v7  ;;  %p72_p3 = por %p71_p2, %p70_p1 }
   0xa   :  { %28 = vadd.xlane.f32.xlu0 %v27_v6 }
   0xb   :  { %p73_p4 = pnand %p72_p3, %p66_p0 }
   0xd   :  { %76 = shalt.err (!%p73_p4)
}
   0xe   :  { %55 = dma.vmem_to_hbm [thread:$0]  %s53_s20, 64, %s134_s4, [#allocation3]   ;;  %v37_v11 = vlaneseq  ;;  %v35_v13 = vld [vmem:[%s132_s2] sm:$0x1] }
   0xf   :  { %v36_v14 = vunpack.c.l.bf16 %v35_v13 }
  0x10   :  { %v38_v12 = vshrl.u32 %v37_v11, 7 }
  0x12   :  { %v39_v15 = vsub.s32 0, %v38_v12 }
  0x14   :  { %v40_v16 = vrot.slane %v36_v14, %v39_v15 }
  0x93   :  { %v29_v8 = vpop.xlane.xlu0 %28 }
  0x94   :  { %v31_v9 = vmul.f32 0.03125, %v29_v8 }
  0x96   :  { %v32_v10 = vadd.f32 1e-06, %v31_v9 }
  0x98   :  { %63 = vrsqrt.f32 %v32_v10 }
  0xa5   :  { %v64_v17 = vpop.eup %63 }
  0xa6   :  { %v34_v18 = vmul.f32 %v64_v17, %v21_v4 }
  0xa8   :  { %v41_v19 = vmul.f32 %v40_v16, %v34_v18 }
  0xaa   :  { %v42_v20 = vpack.c.bf16 %v41_v19, %v41_v19 }
  0xac   :  { %43 = vst.msk [vmem:[%s133_s3] sm:$0xf] %vm23_vm1, %v42_v20 }
  0xad   :  { %85 = dma.done.wait [#allocation3], 64  }
  0xae   :  { %86 = vsyncadd [#allocation3], 4294967232 }
  0xaf   :  { %61 = vsyncpa [#allocation3], 1 }

// kernel: qwen_block.12
= control target key start
LH: loop header
LB: loop body
LE: loop exit
PB: predicated region body
PF: predicated region fallthrough
CT: control target
= control target key end

     0   :  { %vm19_vm0 = vcmask 523264   ;;  %v205_v0 = vmov 0.0   ;;  %vm206_vm1 = vmmov 0   ;;  %vm40_vm2 = vcmask 261120   ;;  %s249_s1 = inlined_call_operand.vmem [shape: bf16[32,64], index: 1, kind: input, shape index: {}]   ;;  %s250_s2 = inlined_call_operand.vmem [shape: bf16[32,64], index: 2, kind: input, shape index: {}]   ;;  %s251_s0 = inlined_call_operand.vmem [shape: bf16[8,32], index: 0, kind: input, shape index: {}]   ;;  %s252_s3 = inlined_call_operand.vmem [shape: bf16[8,64], index: 3, kind: output, shape index: {}]  }
   0x1   :  { %179 = vmatprep.subr.bf16.mxu0 %v205_v0  ;;  %v197_v1 = vld [vmem:[%s249_s1 + $0x8] sm:$0xff]   ;;  %183 = vmatprep.mubr.msk.bf16.mxu0 %vm206_vm1, %v205_v0  ;;  %20 = vst.msk [vmem:[#allocation2] sm:$0xff] %vm19_vm0, %v205_v0  ;;  %21 = vst.msk [vmem:[#allocation3] sm:$0xff] %vm19_vm0, %v205_v0  ;;  %v198_v2 = vld [vmem:[%s249_s1] sm:$0xff]   ;;  %vm160_vm3 = vcmask 519168  }
   0x2   :  { %187 = vmatprep.subr.bf16.mxu1 %v205_v0  ;;  %191 = vmatprep.mubr.msk.bf16.mxu1 %vm206_vm1, %v205_v0  ;;  %v199_v3 = vld [vmem:[%s250_s2 + $0x8] sm:$0xff]   ;;  %v200_v4 = vld [vmem:[%s250_s2] sm:$0xff]  }
   0x3   :  { %180 = vmatpush3.bf16.msra.mxu0 %v197_v1  ;;  %188 = vmatpush3.bf16.msra.mxu1 %v199_v3  ;;  %v22_v5 = vld [vmem:[%s251_s0] sm:$0xf] }
   0x4   :  { %181 = vmatprep.subr.bf16.mxu0 %v205_v0  ;;  %189 = vmatprep.subr.bf16.mxu1 %v205_v0 }
   0x7   :  { %182 = vmatpush3.bf16.msra.mxu0 %v198_v2  ;;  %190 = vmatpush3.bf16.msra.mxu1 %v200_v4 }
   0x8   :  { %v23_v6 = vld [vmem:[#allocation2] sm:$0xff]  ;;  %v87_v9 = vld [vmem:[#allocation3] sm:$0xff] }
   0xa   :  { %184 = vmatmul.mubr.msk.bf16.vlgmr.msra.gmra.mxu0 %vm40_vm2, %v22_v5  ;;  %192 = vmatmul.mubr.msk.bf16.vlgmr.msra.gmra.mxu1 %vm40_vm2, %v22_v5 }
  0xca   :  { %v78_v7 = vpop.f32.mrf.mxu0  ;;  %v138_v11 = vpop.f32.mrf.mxu1 }
  0xcb   :  { %v84_v8 = vadd.f32 %v78_v7, %v23_v6  ;;  %v144_v13 = vadd.f32 %v138_v11, %v87_v9 }
  0xcc   :  { %v185_v10 = vpop.f32.mrf.mxu0  ;;  %v193_v14 = vpop.f32.mrf.mxu1 }
  0xcd   :  { %86 = vst.msk [vmem:[#allocation2] sm:$0xff] %vm19_vm0, %v84_v8  ;;  %145 = vst.msk [vmem:[#allocation3] sm:$0xff] %vm19_vm0, %v144_v13 }
  0xce   :  { %v81_v12 = vpop.f32.mrf.mxu0  ;;  %v141_v16 = vpop.f32.mrf.mxu1 }
  0xd0   :  { %v186_v15 = vpop.f32.mrf.mxu0  ;;  %v194_v17 = vpop.f32.mrf.mxu1 }
  0xd4   :  { %v149_v18 = vld [vmem:[#allocation2] sm:$0xff]  ;;  %v157_v23 = vld [vmem:[#allocation3] sm:$0xff] }
  0xd5   :  { %v172_v19 = vmul.f32 -1.442695, %v149_v18 }
  0xd7   :  { %201 = vpow2.f32 %v172_v19 }
  0xe4   :  { %v202_v20 = vpop.eup %201 }
  0xe5   :  { %v153_v21 = vadd.f32 1.0, %v202_v20 }
  0xe7   :  { %203 = vrcp.f32 %v153_v21 }
  0xf4   :  { %v204_v22 = vpop.eup %203 }
  0xf5   :  { %v156_v24 = vmul.f32 %v204_v22, %v149_v18 }
  0xf7   :  { %v158_v25 = vmul.f32 %v157_v23, %v156_v24 }
  0xf9   :  { %v159_v26 = vpack.c.bf16 %v158_v25, %v158_v25 }
  0xfb   :  { %161 = vst.msk [vmem:[%s252_s3] sm:$0xf] %vm160_vm3, %v159_v26 }

// kernel: qwen_block.13
= control target key start
LH: loop header
LB: loop body
LE: loop exit
PB: predicated region body
PF: predicated region fallthrough
CT: control target
= control target key end

     0   :  { %v172_v1 = vmov 0.0   ;;  %vm173_vm0 = vmmov 0   ;;  %vm17_vm1 = vcmask 261120   ;;  %s210_s0 = inlined_call_operand.vmem [shape: bf16[8,64], index: 0, kind: input, shape index: {}]   ;;  %s211_s1 = inlined_call_operand.vmem [shape: bf16[64,32], index: 1, kind: input, shape index: {}]   ;;  %s212_s2 = inlined_call_operand.hbm [shape: bf16[8,32], index: 2, kind: output, shape index: {}]  }
   0x1   :  { %v146_v0 = vld [vmem:[%s211_s1 + $0x18] sm:$0xff]   ;;  %131 = vmatprep.subr.bf16.mxu0 %v172_v1  ;;  %v147_v2 = vld [vmem:[%s211_s1 + $0x10] sm:$0xff]   ;;  %139 = vmatprep.mubr.msk.bf16.mxu0 %vm173_vm0, %v172_v1  ;;  %18 = vst.msk [vmem:[#allocation2] sm:$0xff] %vm17_vm1, %v172_v1 }
   0x2   :  { %132 = vmatpush3.bf16.msra.mxu0 %v146_v0 }
   0x3   :  { %133 = vmatprep.subr.bf16.mxu0 %v172_v1 }
   0x4   :  { %7 = vsyncpa [#allocation4], 0  ;;  %v148_v3 = vld [vmem:[%s211_s1 + $0x8] sm:$0xff]   ;;  %v149_v4 = vld [vmem:[%s211_s1] sm:$0xff]   ;;  %vm53_vm2 = vcmask 523264   ;;  %s174_s19 = smov [#allocation3]  }
   0x5   :  { %v20_v5 = vld [vmem:[%s210_s0] sm:$0xf]  ;;  %s113_s20 = sshll.u32 %s174_s19, 4  ;;  %vm105_vm3 = vcmask 257024   ;;  %s114_s20 = int_to_ptr.vmem [resolvable:$true] %s113_s20 }
   0x6   :  { %134 = vmatpush3.bf16.msra.mxu0 %v147_v2  ;;  %s150_s1 = scalar_lea.vmem %s114_s20, 64  ;;  %p155_p1 = scmp.lt.s32.totalorder %s114_s20, %s114_s20 }
   0x7   :  { %135 = vmatprep.subr.bf16.mxu0 %v172_v1  ;;  %p151_p0 = scmp.ne.s32.totalorder %s114_s20, %s150_s1  ;;  %p156_p2 = scmp.lt.s32.totalorder %s150_s1, %s150_s1 }
   0x8   :  { %v19_v6 = vld [vmem:[#allocation2] sm:$0xff] }
   0x9   :  { %p157_p3 = por %p156_p2, %p155_p1 }
   0xa   :  { %136 = vmatpush3.bf16.msra.mxu0 %v148_v3 }
   0xb   :  { %137 = vmatprep.subr.bf16.mxu0 %v172_v1  ;;  %p158_p4 = pnand %p157_p3, %p151_p0 }
   0xe   :  { %138 = vmatpush3.bf16.msra.mxu0 %v149_v4 }
  0x11   :  { %140 = vmatmul.mubr.msk.bf16.vlgmr.msra.gmra.mxu0 %vm53_vm2, %v20_v5 }
  0xd1   :  { %v91_v7 = vpop.f32.mrf.mxu0 }
  0xd2   :  { %v97_v8 = vadd.f32 %v91_v7, %v19_v6 }
  0xd3   :  { %v141_v9 = vpop.f32.mrf.mxu0 }
  0xd4   :  { %99 = vst.msk [vmem:[#allocation2] sm:$0xff] %vm17_vm1, %v97_v8 }
  0xd5   :  { %v94_v10 = vpop.f32.mrf.mxu0 }
  0xd7   :  { %v142_v11 = vpop.f32.mrf.mxu0 }
  0xdb   :  { %v103_v12 = vld [vmem:[#allocation2] sm:$0xff] }
  0xdc   :  { %v104_v13 = vpack.c.bf16 %v103_v12, %v103_v12 }
  0xde   :  { %106 = vst.msk [vmem:[#allocation3] sm:$0xf] %vm105_vm3, %v104_v13 }
  0xdf   :  { %161 = shalt.err (!%p158_p4)
}
  0xe0   :  { %116 = dma.vmem_to_hbm [thread:$0]  %s114_s20, 64, %s212_s2, [#allocation4]  }
  0xe1   :  { %170 = dma.done.wait [#allocation4], 64  }
  0xe2   :  { %171 = vsyncadd [#allocation4], 4294967232 }
  0xe3   :  { %120 = vsyncpa [#allocation4], 1 }

</bundles_post_ra>
